<compile_context>
chip_gen: v6e
topology: v6e:2x2x1
jax: 0.10.0
libtpu: 0.0.40
codegen_flags: <defaults>
</compile_context>

<pallas_src>
import functools

import jax
import jax.numpy as jnp
from jax.experimental import pallas as pl
from jax.experimental.pallas import tpu as pltpu


# ------------------------------ tiling helper -------------------------------

def _pick_tile(dim, target, align):
    """Largest multiple of `align` that divides `dim` and is <= `target`;
    falls back to the full dim (always a legal BlockSpec extent)."""
    if dim <= target or dim % align != 0:
        return dim
    t = (target // align) * align
    while t >= align:
        if dim % t == 0:
            return t
        t -= align
    return dim


# ------------------------------ Pallas kernels -------------------------------

def _ln_linear(x, gamma, beta, w, b=None, activation=None, *,
               eps=1e-5, out_dtype=jnp.float32, tm_target=256, tn_target=512):
    """act(LayerNorm(x) @ w + b).

    x: (M, K) f32 residual stream; w: (K, N) bf16; b: (N,) f32 or None.
    Grid (M//tm, N//tn), K kept whole so the fused LN sees the full feature dim.
    LN / bias / gelu_new / tanh are VPU+EUP epilogue work hidden under the MXU.
    """
    M, K = x.shape
    N = w.shape[1]
    tm = _pick_tile(M, tm_target, 8)
    tn = _pick_tile(N, tn_target, 128)
    has_bias = b is not None

    def kernel(*refs):
        if has_bias:
            x_ref, g_ref, be_ref, w_ref, bias_ref, o_ref = refs
        else:
            x_ref, g_ref, be_ref, w_ref, o_ref = refs
            bias_ref = None
        xv = x_ref[...]
        mean = jnp.mean(xv, axis=-1, keepdims=True)
        var = jnp.mean(jnp.square(xv - mean), axis=-1, keepdims=True)
        xn = (xv - mean) * jax.lax.rsqrt(var + eps) * g_ref[...] + be_ref[...]
        y = jnp.dot(xn.astype(jnp.bfloat16), w_ref[...],
                    preferred_element_type=jnp.float32)
        if bias_ref is not None:
            y = y + bias_ref[...]
        if activation == "gelu_new":
            # GPT-2 "gelu_new" (tanh approximation); y*y*y instead of pow().
            y = 0.5 * y * (1.0 + jnp.tanh(
                0.7978845608028654 * (y + 0.044715 * y * y * y)))
        elif activation == "tanh":
            y = jnp.tanh(y)
        o_ref[...] = y.astype(o_ref.dtype)

    in_specs = [
        pl.BlockSpec((tm, K), lambda i, j: (i, 0)),
        pl.BlockSpec((1, K), lambda i, j: (0, 0)),
        pl.BlockSpec((1, K), lambda i, j: (0, 0)),
        pl.BlockSpec((K, tn), lambda i, j: (0, j)),
    ]
    args = [x, gamma.reshape(1, K), beta.reshape(1, K), w]
    if has_bias:
        in_specs.append(pl.BlockSpec((1, tn), lambda i, j: (0, j)))
        args.append(b.reshape(1, N))

    return pl.pallas_call(
        kernel,
        out_shape=jax.ShapeDtypeStruct((M, N), out_dtype),
        grid=(M // tm, N // tn),
        in_specs=in_specs,
        out_specs=pl.BlockSpec((tm, tn), lambda i, j: (i, j)),
        compiler_params=pltpu.CompilerParams(
            dimension_semantics=("parallel", "parallel")),
    )(*args)


def _linear_residual(x, w, b, resid, *, out_dtype=jnp.float32,
                     tm_target=256, tn_target=256, tk_target=512):
    """resid + x @ w + b with a K-tiled reduction and f32 VMEM accumulator.

    x: (M, K) bf16 activations; w: (K, N) bf16; b: (N,) f32; resid: (M, N) f32.
    """
    M, K = x.shape
    N = w.shape[1]
    tm = _pick_tile(M, tm_target, 8)
    tn = _pick_tile(N, tn_target, 128)
    tk = _pick_tile(K, tk_target, 128)

    def kernel(x_ref, w_ref, b_ref, r_ref, o_ref, acc_ref):
        @pl.when(pl.program_id(2) == 0)
        def _():
            acc_ref[...] = jnp.zeros_like(acc_ref)

        acc_ref[...] += jnp.dot(x_ref[...], w_ref[...],
                                preferred_element_type=jnp.float32)

        @pl.when(pl.program_id(2) == pl.num_programs(2) - 1)
        def _():
            o_ref[...] = (r_ref[...] + acc_ref[...] + b_ref[...]).astype(o_ref.dtype)

    return pl.pallas_call(
        kernel,
        out_shape=jax.ShapeDtypeStruct((M, N), out_dtype),
        grid=(M // tm, N // tn, K // tk),
        in_specs=[
            pl.BlockSpec((tm, tk), lambda i, j, k: (i, k)),
            pl.BlockSpec((tk, tn), lambda i, j, k: (k, j)),
            pl.BlockSpec((1, tn), lambda i, j, k: (0, j)),
            pl.BlockSpec((tm, tn), lambda i, j, k: (i, j)),
        ],
        out_specs=pl.BlockSpec((tm, tn), lambda i, j, k: (i, j)),
        scratch_shapes=[pltpu.VMEM((tm, tn), jnp.float32)],
        compiler_params=pltpu.CompilerParams(
            dimension_semantics=("parallel", "parallel", "arbitrary")),
    )(x, w, b.reshape(1, N), resid)


def _causal_attention(q, k, v, n_head, *, tq_target=256, tk_target=256):
    """Flash-style causal multi-head attention, all heads packed per grid step.

    q, k, v: (B, T, D) bf16 with D = n_head * Dh, head-major columns.
    Returns (B, T, D) bf16 (same head-major layout -> feeds c_proj directly).
    """
    B, T, D = q.shape
    H = n_head
    Dh = D // H
    scale = 1.0 / float(Dh) ** 0.5
    tq = _pick_tile(T, tq_target, 8)
    tk = _pick_tile(T, tk_target, 8)
    neg = -1e30

    def kernel(q_ref, k_ref, v_ref, o_ref, m_scr, l_scr, acc_scr):
        qi = pl.program_id(1)
        ki = pl.program_id(2)
        nk = pl.num_programs(2)
        q_start = qi * tq
        k_start = ki * tk

        @pl.when(ki == 0)
        def _():
            m_scr[...] = jnp.full_like(m_scr, neg)
            l_scr[...] = jnp.zeros_like(l_scr)
            acc_scr[...] = jnp.zeros_like(acc_scr)

        # Skip KV tiles entirely above the causal diagonal (~2x fewer MXU flops).
        @pl.when(k_start <= q_start + tq - 1)
        def _():
            row = q_start + jax.lax.broadcasted_iota(jnp.int32, (tq, tk), 0)
            col = k_start + jax.lax.broadcasted_iota(jnp.int32, (tq, tk), 1)
            mask = col <= row
            for h in range(H):
                sl = slice(h * Dh, (h + 1) * Dh)
                # scale q (tq*Dh muls) instead of the (tq, tk) score matrix
                qh = (q_ref[0, :, sl].astype(jnp.float32) * scale
                      ).astype(jnp.bfloat16)                         # (tq, Dh)
                kh = k_ref[0, :, sl]                                  # (tk, Dh)
                vh = v_ref[0, :, sl]                                  # (tk, Dh)
                s = jnp.dot(qh, kh.T, preferred_element_type=jnp.float32)
                s = jnp.where(mask, s, neg)
                m_prev = m_scr[h]                                     # (tq, 1)
                l_prev = l_scr[h]
                m_new = jnp.maximum(m_prev, jnp.max(s, axis=-1, keepdims=True))
                alpha = jnp.exp(m_prev - m_new)
                p = jnp.exp(s - m_new)
                l_scr[h] = alpha * l_prev + jnp.sum(p, axis=-1, keepdims=True)
                acc_scr[:, sl] = alpha * acc_scr[:, sl] + jnp.dot(
                    p.astype(jnp.bfloat16), vh,
                    preferred_element_type=jnp.float32)
                m_scr[h] = m_new

        @pl.when(ki == nk - 1)
        def _():
            for h in range(H):
                sl = slice(h * Dh, (h + 1) * Dh)
                inv = pl.reciprocal(l_scr[h], approx=True)            # (tq, 1)
                o_ref[0, :, sl] = (acc_scr[:, sl] * inv).astype(o_ref.dtype)

    q_spec = pl.BlockSpec((1, tq, D), lambda b, i, j: (b, i, 0))
    kv_spec = pl.BlockSpec((1, tk, D), lambda b, i, j: (b, j, 0))

    return pl.pallas_call(
        kernel,
        out_shape=jax.ShapeDtypeStruct((B, T, D), jnp.bfloat16),
        grid=(B, T // tq, T // tk),
        in_specs=[q_spec, kv_spec, kv_spec],
        out_specs=q_spec,
        scratch_shapes=[
            pltpu.VMEM((H, tq, 1), jnp.float32),   # running max, per head
            pltpu.VMEM((H, tq, 1), jnp.float32),   # running denom, per head
            pltpu.VMEM((tq, D), jnp.float32),      # output accumulator
        ],
        compiler_params=pltpu.CompilerParams(
            dimension_semantics=("parallel", "parallel", "arbitrary")),
    )(q, k, v)


# ------------------------------- parameters ----------------------------------

def init_params(key, *, vocab_size, n_positions, n_embd, n_layer, n_head):
    keys = jax.random.split(key, 4 + 6 * n_layer)
    std = 0.02
    f32, bf16 = jnp.float32, jnp.bfloat16
    params = {
        "wte": jax.random.normal(keys[0], (vocab_size, n_embd), f32) * std,
        "wpe": jax.random.normal(keys[1], (n_positions, n_embd), f32) * 0.01,
        "ln_f_g": jnp.ones((n_embd,), f32),
        "ln_f_b": jnp.zeros((n_embd,), f32),
        # policy head: nn.Linear(n_embd, vocab, bias=False), stored (in, out), bf16
        "policy_w": (jax.random.normal(keys[2], (n_embd, vocab_size), f32) * std).astype(bf16),
        # value head: nn.Linear(n_embd, 1)
        "value_w": (jax.random.normal(keys[3], (n_embd, 1), f32) * std).astype(bf16),
        "value_b": jnp.zeros((1,), f32),
        "h": [],
    }
    for l in range(n_layer):
        k = keys[4 + 6 * l: 4 + 6 * (l + 1)]
        # HF Conv1D c_attn weight is (n_embd, 3*n_embd); store its q/k/v column
        # blocks separately so the forward never splits/transposes activations.
        c_attn = jax.random.normal(k[0], (n_embd, 3 * n_embd), f32) * std
        params["h"].append({
            "ln_1_g": jnp.ones((n_embd,), f32),
            "ln_1_b": jnp.zeros((n_embd,), f32),
            "q_w": c_attn[:, :n_embd].astype(bf16),
            "k_w": c_attn[:, n_embd:2 * n_embd].astype(bf16),
            "v_w": c_attn[:, 2 * n_embd:].astype(bf16),
            "q_b": jnp.zeros((n_embd,), f32),
            "k_b": jnp.zeros((n_embd,), f32),
            "v_b": jnp.zeros((n_embd,), f32),
            "c_proj_w": (jax.random.normal(k[1], (n_embd, n_embd), f32) * std).astype(bf16),
            "c_proj_b": jnp.zeros((n_embd,), f32),
            "ln_2_g": jnp.ones((n_embd,), f32),
            "ln_2_b": jnp.zeros((n_embd,), f32),
            "mlp_fc_w": (jax.random.normal(k[2], (n_embd, 4 * n_embd), f32) * std).astype(bf16),
            "mlp_fc_b": jnp.zeros((4 * n_embd,), f32),
            "mlp_proj_w": (jax.random.normal(k[3], (4 * n_embd, n_embd), f32) * std).astype(bf16),
            "mlp_proj_b": jnp.zeros((n_embd,), f32),
        })
    return params


# ------------------------------- model glue -----------------------------------

def gpt2_block(h2d, layer, B, T, n_embd, n_head):
    # --- attention sub-block: ln_1 fused into the q/k/v projections ---
    q = _ln_linear(h2d, layer["ln_1_g"], layer["ln_1_b"], layer["q_w"],
                   layer["q_b"], out_dtype=jnp.bfloat16)
    k = _ln_linear(h2d, layer["ln_1_g"], layer["ln_1_b"], layer["k_w"],
                   layer["k_b"], out_dtype=jnp.bfloat16)
    v = _ln_linear(h2d, layer["ln_1_g"], layer["ln_1_b"], layer["v_w"],
                   layer["v_b"], out_dtype=jnp.bfloat16)
    attn = _causal_attention(q.reshape(B, T, n_embd),
                             k.reshape(B, T, n_embd),
                             v.reshape(B, T, n_embd), n_head)
    attn = attn.reshape(B * T, n_embd)           # free row-major reshape, no transpose
    # c_proj with the residual add fused in-kernel
    h2d = _linear_residual(attn, layer["c_proj_w"], layer["c_proj_b"], h2d)
    # --- MLP sub-block: ln_2 + gelu_new fused into mlp_fc ---
    mlp = _ln_linear(h2d, layer["ln_2_g"], layer["ln_2_b"], layer["mlp_fc_w"],
                     layer["mlp_fc_b"], activation="gelu_new",
                     out_dtype=jnp.bfloat16)
    h2d = _linear_residual(mlp, layer["mlp_proj_w"], layer["mlp_proj_b"], h2d)
    return h2d


def base_hf_gpt_forward(params, input_ids, value_targets=None, compute_loss=False,
                        *, n_embd, n_head):
    """Pallas implementation of BaseHFGPT.forward (GPT2Model + policy/value heads).
    Dropout layers are identity (eval mode)."""
    B, T = input_ids.shape
    vocab = params["wte"].shape[0]

    # token + position embeddings (gather stays in glue)
    x = params["wte"][input_ids] + params["wpe"][jnp.arange(T)][None, :, :]
    h2d = x.reshape(B * T, n_embd).astype(jnp.float32)

    for layer in params["h"]:
        h2d = gpt2_block(h2d, layer, B, T, n_embd, n_head)

    # ln_f fused into both heads; policy head uses the bias-free path (no zero DMA)
    # TODO(synk): real HF vocab sizes (e.g. 50257) should be padded to a 128
    # multiple so the policy-head N axis can be tiled instead of full-extent.
    logits = _ln_linear(h2d, params["ln_f_g"], params["ln_f_b"],
                        params["policy_w"], None, out_dtype=jnp.float32)
    values = _ln_linear(h2d, params["ln_f_g"], params["ln_f_b"],
                        params["value_w"], params["value_b"],
                        activation="tanh", out_dtype=jnp.float32)

    logits = logits.reshape(B, T, vocab)
    values = values.reshape(B, T, 1)

    if compute_loss and value_targets is not None:
        lg = logits[:, :-1, :].reshape(-1, vocab)
        tg = input_ids[:, 1:].reshape(-1)
        logp = jax.nn.log_softmax(lg, axis=-1)
        loss_policy = -jnp.mean(jnp.take_along_axis(logp, tg[:, None], axis=-1))
        loss_value = jnp.mean(
            (values[:, :-1].reshape(-1) - value_targets[:, 1:].reshape(-1)) ** 2)
        loss = loss_policy + loss_value
        return logits, values, (loss, loss_policy, loss_value)
    return logits, values


# ---------------------------------- main ---------------------------------------

if __name__ == "__main__":
    # small GPT-2 config
    vocab_size, n_positions, n_embd, n_layer, n_head = 64, 16, 32, 2, 4
    B, T = 2, 8

    key = jax.random.PRNGKey(0)
    kp, kx, kv = jax.random.split(key, 3)
    params = init_params(kp, vocab_size=vocab_size, n_positions=n_positions,
                         n_embd=n_embd, n_layer=n_layer, n_head=n_head)

    input_ids = jax.random.randint(kx, (B, T), 0, vocab_size, dtype=jnp.int32)
    value_targets = jax.random.uniform(kv, (B, T), jnp.float32, -1.0, 1.0)

    fwd = jax.jit(functools.partial(base_hf_gpt_forward,
                                    n_embd=n_embd, n_head=n_head,
                                    compute_loss=False))
    fwd_loss = jax.jit(functools.partial(base_hf_gpt_forward,
                                         n_embd=n_embd, n_head=n_head,
                                         compute_loss=True))

    logits, values = fwd(params, input_ids)
    jax.block_until_ready((logits, values))
    assert logits.shape == (B, T, vocab_size)
    assert values.shape == (B, T, 1)
    assert bool(jnp.all(jnp.abs(values) <= 1.0))

    logits2, values2, (loss, loss_p, loss_v) = fwd_loss(params, input_ids, value_targets)
    jax.block_until_ready(loss)
    assert jnp.isfinite(loss)

    print("KERNEL_OK")
</pallas_src>

<mosaic_0001>
module attributes {stable_mosaic.version = 11 : i64} {
  func.func @kernel(%arg0: i32, %arg1: i32, %arg2: memref<16x32xf32, #tpu.memory_space<vmem>>, %arg3: memref<1x32xf32, #tpu.memory_space<vmem>>, %arg4: memref<1x32xf32, #tpu.memory_space<vmem>>, %arg5: memref<32x128xbf16, #tpu.memory_space<vmem>>, %arg6: memref<1x128xf32, #tpu.memory_space<vmem>>, %arg7: memref<16x128xbf16, #tpu.memory_space<vmem>>) attributes {dimension_semantics = [#tpu.dimension_semantics<parallel>, #tpu.dimension_semantics<parallel>], iteration_bounds = array<i64: 1, 1>, scalar_prefetch = 0 : i64, scratch_operands = 0 : i64, tpu.core_type = #tpu.core_type<tc>, window_params = [{transform_indices = @transform_0, window_bounds = array<i64: 16, 32>}, {pipeline_mode = #tpu.pipeline_mode<synchronous>, transform_indices = @transform_1, window_bounds = array<i64: 1, 32>}, {pipeline_mode = #tpu.pipeline_mode<synchronous>, transform_indices = @transform_2, window_bounds = array<i64: 1, 32>}, {transform_indices = @transform_3, window_bounds = array<i64: 32, 128>}, {transform_indices = @transform_4, window_bounds = array<i64: 1, 128>}, {transform_indices = @transform_5, window_bounds = array<i64: 16, 128>}]} {
    %c0 = arith.constant 0 : index
    %c0_0 = arith.constant 0 : index
    %0 = vector.load %arg2[%c0, %c0_0] : memref<16x32xf32, #tpu.memory_space<vmem>>, vector<16x32xf32>
    %cst = arith.constant dense<0.000000e+00> : vector<16xf32>
    %1 = vector.multi_reduction <add>, %0, %cst [1] : vector<16x32xf32> to vector<16xf32>
    %2 = vector.shape_cast %1 : vector<16xf32> to vector<16x1xf32>
    %cst_1 = arith.constant 3.200000e+01 : f32
    %3 = vector.broadcast %cst_1 : f32 to vector<16x1xf32>
    %4 = arith.divf %2, %3 : vector<16x1xf32>
    %5 = vector.broadcast %4 : vector<16x1xf32> to vector<16x32xf32>
    %6 = arith.subf %0, %5 : vector<16x32xf32>
    %7 = arith.mulf %6, %6 : vector<16x32xf32>
    %cst_2 = arith.constant dense<0.000000e+00> : vector<16xf32>
    %8 = vector.multi_reduction <add>, %7, %cst_2 [1] : vector<16x32xf32> to vector<16xf32>
    %9 = vector.shape_cast %8 : vector<16xf32> to vector<16x1xf32>
    %cst_3 = arith.constant 3.200000e+01 : f32
    %10 = vector.broadcast %cst_3 : f32 to vector<16x1xf32>
    %11 = arith.divf %9, %10 : vector<16x1xf32>
    %12 = vector.broadcast %4 : vector<16x1xf32> to vector<16x32xf32>
    %13 = arith.subf %0, %12 : vector<16x32xf32>
    %cst_4 = arith.constant 9.99999974E-6 : f32
    %14 = vector.broadcast %cst_4 : f32 to vector<16x1xf32>
    %15 = arith.addf %11, %14 : vector<16x1xf32>
    %16 = math.rsqrt %15 : vector<16x1xf32>
    %17 = vector.broadcast %16 : vector<16x1xf32> to vector<16x32xf32>
    %18 = arith.mulf %13, %17 : vector<16x32xf32>
    %c0_5 = arith.constant 0 : index
    %c0_6 = arith.constant 0 : index
    %19 = vector.load %arg3[%c0_5, %c0_6] : memref<1x32xf32, #tpu.memory_space<vmem>>, vector<1x32xf32>
    %20 = vector.broadcast %19 : vector<1x32xf32> to vector<16x32xf32>
    %21 = arith.mulf %18, %20 : vector<16x32xf32>
    %c0_7 = arith.constant 0 : index
    %c0_8 = arith.constant 0 : index
    %22 = vector.load %arg4[%c0_7, %c0_8] : memref<1x32xf32, #tpu.memory_space<vmem>>, vector<1x32xf32>
    %23 = vector.broadcast %22 : vector<1x32xf32> to vector<16x32xf32>
    %24 = arith.addf %21, %23 : vector<16x32xf32>
    %25 = arith.truncf %24 : vector<16x32xf32> to vector<16x32xbf16>
    %c0_9 = arith.constant 0 : index
    %c0_10 = arith.constant 0 : index
    %26 = vector.load %arg5[%c0_9, %c0_10] : memref<32x128xbf16, #tpu.memory_space<vmem>>, vector<32x128xbf16>
    %cst_11 = arith.constant dense<0.000000e+00> : vector<16x128xf32>
    %27 = tpu.matmul %25, %26, %cst_11 {dimension_numbers = #tpu.dot_dimension_numbers<[1], [0], [0], [1], [0, 0, 1, 1], [], []>} : vector<16x32xbf16>, vector<32x128xbf16>, vector<16x128xf32> -> vector<16x128xf32>
    %c0_12 = arith.constant 0 : index
    %c0_13 = arith.constant 0 : index
    %28 = vector.load %arg6[%c0_12, %c0_13] : memref<1x128xf32, #tpu.memory_space<vmem>>, vector<1x128xf32>
    %29 = vector.broadcast %28 : vector<1x128xf32> to vector<16x128xf32>
    %30 = arith.addf %27, %29 : vector<16x128xf32>
    %cst_14 = arith.constant 5.000000e-01 : f32
    %31 = vector.broadcast %cst_14 : f32 to vector<16x128xf32>
    %32 = arith.mulf %31, %30 : vector<16x128xf32>
    %cst_15 = arith.constant 4.471500e-02 : f32
    %33 = vector.broadcast %cst_15 : f32 to vector<16x128xf32>
    %34 = arith.mulf %33, %30 : vector<16x128xf32>
    %35 = arith.mulf %34, %30 : vector<16x128xf32>
    %36 = arith.mulf %35, %30 : vector<16x128xf32>
    %37 = arith.addf %30, %36 : vector<16x128xf32>
    %cst_16 = arith.constant 0.797884583 : f32
    %38 = vector.broadcast %cst_16 : f32 to vector<16x128xf32>
    %39 = arith.mulf %38, %37 : vector<16x128xf32>
    %40 = math.tanh %39 : vector<16x128xf32>
    %cst_17 = arith.constant 1.000000e+00 : f32
    %41 = vector.broadcast %cst_17 : f32 to vector<16x128xf32>
    %42 = arith.addf %41, %40 : vector<16x128xf32>
    %43 = arith.mulf %32, %42 : vector<16x128xf32>
    %44 = arith.truncf %43 : vector<16x128xf32> to vector<16x128xbf16>
    %c0_18 = arith.constant 0 : index
    %c0_19 = arith.constant 0 : index
    %45 = vector.load %arg7[%c0_18, %c0_19] : memref<16x128xbf16, #tpu.memory_space<vmem>>, vector<16x128xbf16>
    tpu.vector_store %arg7[%c0_18, %c0_19], %44 {strides = array<i32>} : memref<16x128xbf16, #tpu.memory_space<vmem>>, vector<16x128xbf16>,
    return
  }
  func.func @transform_0(%arg0: i32, %arg1: i32) -> (i32, i32) {
    %c0_i32 = arith.constant 0 : i32
    %c0_i32_0 = arith.constant 0 : i32
    return %arg0, %c0_i32 : i32, i32
  }
  func.func @transform_1(%arg0: i32, %arg1: i32) -> (i32, i32) {
    %c0_i32 = arith.constant 0 : i32
    %c0_i32_0 = arith.constant 0 : i32
    %c0_i32_1 = arith.constant 0 : i32
    return %c0_i32, %c0_i32_0 : i32, i32
  }
  func.func @transform_2(%arg0: i32, %arg1: i32) -> (i32, i32) {
    %c0_i32 = arith.constant 0 : i32
    %c0_i32_0 = arith.constant 0 : i32
    %c0_i32_1 = arith.constant 0 : i32
    return %c0_i32, %c0_i32_0 : i32, i32
  }
  func.func @transform_3(%arg0: i32, %arg1: i32) -> (i32, i32) {
    %c0_i32 = arith.constant 0 : i32
    %c0_i32_0 = arith.constant 0 : i32
    return %c0_i32, %arg1 : i32, i32
  }
  func.func @transform_4(%arg0: i32, %arg1: i32) -> (i32, i32) {
    %c0_i32 = arith.constant 0 : i32
    %c0_i32_0 = arith.constant 0 : i32
    return %c0_i32, %arg1 : i32, i32
  }
  func.func @transform_5(%arg0: i32, %arg1: i32) -> (i32, i32) {
    %c0_i32 = arith.constant 0 : i32
    return %arg0, %arg1 : i32, i32
  }
}

module attributes {stable_mosaic.version = 11 : i64} {
  func.func @kernel(%arg0: i32, %arg1: i32, %arg2: memref<16x32xf32, #tpu.memory_space<vmem>>, %arg3: memref<1x32xf32, #tpu.memory_space<vmem>>, %arg4: memref<1x32xf32, #tpu.memory_space<vmem>>, %arg5: memref<32x32xbf16, #tpu.memory_space<vmem>>, %arg6: memref<1x32xf32, #tpu.memory_space<vmem>>, %arg7: memref<16x32xbf16, #tpu.memory_space<vmem>>) attributes {dimension_semantics = [#tpu.dimension_semantics<parallel>, #tpu.dimension_semantics<parallel>], iteration_bounds = array<i64: 1, 1>, scalar_prefetch = 0 : i64, scratch_operands = 0 : i64, tpu.core_type = #tpu.core_type<tc>, window_params = [{transform_indices = @transform_0, window_bounds = array<i64: 16, 32>}, {pipeline_mode = #tpu.pipeline_mode<synchronous>, transform_indices = @transform_1, window_bounds = array<i64: 1, 32>}, {pipeline_mode = #tpu.pipeline_mode<synchronous>, transform_indices = @transform_2, window_bounds = array<i64: 1, 32>}, {transform_indices = @transform_3, window_bounds = array<i64: 32, 32>}, {transform_indices = @transform_4, window_bounds = array<i64: 1, 32>}, {transform_indices = @transform_5, window_bounds = array<i64: 16, 32>}]} {
    %c0 = arith.constant 0 : index
    %c0_0 = arith.constant 0 : index
    %0 = vector.load %arg2[%c0, %c0_0] : memref<16x32xf32, #tpu.memory_space<vmem>>, vector<16x32xf32>
    %cst = arith.constant dense<0.000000e+00> : vector<16xf32>
    %1 = vector.multi_reduction <add>, %0, %cst [1] : vector<16x32xf32> to vector<16xf32>
    %2 = vector.shape_cast %1 : vector<16xf32> to vector<16x1xf32>
    %cst_1 = arith.constant 3.200000e+01 : f32
    %3 = vector.broadcast %cst_1 : f32 to vector<16x1xf32>
    %4 = arith.divf %2, %3 : vector<16x1xf32>
    %5 = vector.broadcast %4 : vector<16x1xf32> to vector<16x32xf32>
    %6 = arith.subf %0, %5 : vector<16x32xf32>
    %7 = arith.mulf %6, %6 : vector<16x32xf32>
    %cst_2 = arith.constant dense<0.000000e+00> : vector<16xf32>
    %8 = vector.multi_reduction <add>, %7, %cst_2 [1] : vector<16x32xf32> to vector<16xf32>
    %9 = vector.shape_cast %8 : vector<16xf32> to vector<16x1xf32>
    %cst_3 = arith.constant 3.200000e+01 : f32
    %10 = vector.broadcast %cst_3 : f32 to vector<16x1xf32>
    %11 = arith.divf %9, %10 : vector<16x1xf32>
    %12 = vector.broadcast %4 : vector<16x1xf32> to vector<16x32xf32>
    %13 = arith.subf %0, %12 : vector<16x32xf32>
    %cst_4 = arith.constant 9.99999974E-6 : f32
    %14 = vector.broadcast %cst_4 : f32 to vector<16x1xf32>
    %15 = arith.addf %11, %14 : vector<16x1xf32>
    %16 = math.rsqrt %15 : vector<16x1xf32>
    %17 = vector.broadcast %16 : vector<16x1xf32> to vector<16x32xf32>
    %18 = arith.mulf %13, %17 : vector<16x32xf32>
    %c0_5 = arith.constant 0 : index
    %c0_6 = arith.constant 0 : index
    %19 = vector.load %arg3[%c0_5, %c0_6] : memref<1x32xf32, #tpu.memory_space<vmem>>, vector<1x32xf32>
    %20 = vector.broadcast %19 : vector<1x32xf32> to vector<16x32xf32>
    %21 = arith.mulf %18, %20 : vector<16x32xf32>
    %c0_7 = arith.constant 0 : index
    %c0_8 = arith.constant 0 : index
    %22 = vector.load %arg4[%c0_7, %c0_8] : memref<1x32xf32, #tpu.memory_space<vmem>>, vector<1x32xf32>
    %23 = vector.broadcast %22 : vector<1x32xf32> to vector<16x32xf32>
    %24 = arith.addf %21, %23 : vector<16x32xf32>
    %25 = arith.truncf %24 : vector<16x32xf32> to vector<16x32xbf16>
    %c0_9 = arith.constant 0 : index
    %c0_10 = arith.constant 0 : index
    %26 = vector.load %arg5[%c0_9, %c0_10] : memref<32x32xbf16, #tpu.memory_space<vmem>>, vector<32x32xbf16>
    %cst_11 = arith.constant dense<0.000000e+00> : vector<16x32xf32>
    %27 = tpu.matmul %25, %26, %cst_11 {dimension_numbers = #tpu.dot_dimension_numbers<[1], [0], [0], [1], [0, 0, 1, 1], [], []>} : vector<16x32xbf16>, vector<32x32xbf16>, vector<16x32xf32> -> vector<16x32xf32>
    %c0_12 = arith.constant 0 : index
    %c0_13 = arith.constant 0 : index
    %28 = vector.load %arg6[%c0_12, %c0_13] : memref<1x32xf32, #tpu.memory_space<vmem>>, vector<1x32xf32>
    %29 = vector.broadcast %28 : vector<1x32xf32> to vector<16x32xf32>
    %30 = arith.addf %27, %29 : vector<16x32xf32>
    %31 = arith.truncf %30 : vector<16x32xf32> to vector<16x32xbf16>
    %c0_14 = arith.constant 0 : index
    %c0_15 = arith.constant 0 : index
    %32 = vector.load %arg7[%c0_14, %c0_15] : memref<16x32xbf16, #tpu.memory_space<vmem>>, vector<16x32xbf16>
    tpu.vector_store %arg7[%c0_14, %c0_15], %31 {strides = array<i32>} : memref<16x32xbf16, #tpu.memory_space<vmem>>, vector<16x32xbf16>,
    return
  }
  func.func @transform_0(%arg0: i32, %arg1: i32) -> (i32, i32) {
    %c0_i32 = arith.constant 0 : i32
    %c0_i32_0 = arith.constant 0 : i32
    return %arg0, %c0_i32 : i32, i32
  }
  func.func @transform_1(%arg0: i32, %arg1: i32) -> (i32, i32) {
    %c0_i32 = arith.constant 0 : i32
    %c0_i32_0 = arith.constant 0 : i32
    %c0_i32_1 = arith.constant 0 : i32
    return %c0_i32, %c0_i32_0 : i32, i32
  }
  func.func @transform_2(%arg0: i32, %arg1: i32) -> (i32, i32) {
    %c0_i32 = arith.constant 0 : i32
    %c0_i32_0 = arith.constant 0 : i32
    %c0_i32_1 = arith.constant 0 : i32
    return %c0_i32, %c0_i32_0 : i32, i32
  }
  func.func @transform_3(%arg0: i32, %arg1: i32) -> (i32, i32) {
    %c0_i32 = arith.constant 0 : i32
    %c0_i32_0 = arith.constant 0 : i32
    return %c0_i32, %arg1 : i32, i32
  }
  func.func @transform_4(%arg0: i32, %arg1: i32) -> (i32, i32) {
    %c0_i32 = arith.constant 0 : i32
    %c0_i32_0 = arith.constant 0 : i32
    return %c0_i32, %arg1 : i32, i32
  }
  func.func @transform_5(%arg0: i32, %arg1: i32) -> (i32, i32) {
    %c0_i32 = arith.constant 0 : i32
    return %arg0, %arg1 : i32, i32
  }
}

module attributes {stable_mosaic.version = 11 : i64} {
  func.func @kernel(%arg0: i32, %arg1: i32, %arg2: i32, %arg3: memref<16x32xbf16, #tpu.memory_space<vmem>>, %arg4: memref<32x32xbf16, #tpu.memory_space<vmem>>, %arg5: memref<1x32xf32, #tpu.memory_space<vmem>>, %arg6: memref<16x32xf32, #tpu.memory_space<vmem>>, %arg7: memref<16x32xf32, #tpu.memory_space<vmem>>, %arg8: memref<16x32xf32, #tpu.memory_space<vmem>>) attributes {dimension_semantics = [#tpu.dimension_semantics<parallel>, #tpu.dimension_semantics<parallel>, #tpu.dimension_semantics<arbitrary>], iteration_bounds = array<i64: 1, 1, 1>, scalar_prefetch = 0 : i64, scratch_operands = 1 : i64, tpu.core_type = #tpu.core_type<tc>, window_params = [{transform_indices = @transform_0, window_bounds = array<i64: 16, 32>}, {transform_indices = @transform_1, window_bounds = array<i64: 32, 32>}, {transform_indices = @transform_2, window_bounds = array<i64: 1, 32>}, {transform_indices = @transform_3, window_bounds = array<i64: 16, 32>}, {transform_indices = @transform_4, window_bounds = array<i64: 16, 32>}]} {
    %c0_i32 = arith.constant 0 : i32
    %0 = arith.cmpi eq, %arg2, %c0_i32 : i32
    %1 = arith.extui %0 : i1 to i32
    %c0_i32_0 = arith.constant 0 : i32
    %2 = arith.cmpi ne, %1, %c0_i32_0 : i32
    scf.if %2 {
      %cst_10 = arith.constant 0.000000e+00 : f32
      %12 = vector.broadcast %cst_10 : f32 to vector<16x32xf32>
      %c0_11 = arith.constant 0 : index
      %c0_12 = arith.constant 0 : index
      %13 = vector.load %arg8[%c0_11, %c0_12] : memref<16x32xf32, #tpu.memory_space<vmem>>, vector<16x32xf32>
      tpu.vector_store %arg8[%c0_11, %c0_12], %12 {strides = array<i32>} : memref<16x32xf32, #tpu.memory_space<vmem>>, vector<16x32xf32>,
    } else {
    }
    %c0 = arith.constant 0 : index
    %c0_1 = arith.constant 0 : index
    %3 = vector.load %arg8[%c0, %c0_1] : memref<16x32xf32, #tpu.memory_space<vmem>>, vector<16x32xf32>
    %c0_2 = arith.constant 0 : index
    %c0_3 = arith.constant 0 : index
    %4 = vector.load %arg3[%c0_2, %c0_3] : memref<16x32xbf16, #tpu.memory_space<vmem>>, vector<16x32xbf16>
    %c0_4 = arith.constant 0 : index
    %c0_5 = arith.constant 0 : index
    %5 = vector.load %arg4[%c0_4, %c0_5] : memref<32x32xbf16, #tpu.memory_space<vmem>>, vector<32x32xbf16>
    %cst = arith.constant dense<0.000000e+00> : vector<16x32xf32>
    %6 = tpu.matmul %4, %5, %cst {dimension_numbers = #tpu.dot_dimension_numbers<[1], [0], [0], [1], [0, 0, 1, 1], [], []>} : vector<16x32xbf16>, vector<32x32xbf16>, vector<16x32xf32> -> vector<16x32xf32>
    %7 = arith.addf %3, %6 : vector<16x32xf32>
    %c0_6 = arith.constant 0 : index
    %c0_7 = arith.constant 0 : index
    %8 = vector.load %arg8[%c0_6, %c0_7] : memref<16x32xf32, #tpu.memory_space<vmem>>, vector<16x32xf32>
    tpu.vector_store %arg8[%c0_6, %c0_7], %7 {strides = array<i32>} : memref<16x32xf32, #tpu.memory_space<vmem>>, vector<16x32xf32>,
    %c0_i32_8 = arith.constant 0 : i32
    %9 = arith.cmpi eq, %arg2, %c0_i32_8 : i32
    %10 = arith.extui %9 : i1 to i32
    %c0_i32_9 = arith.constant 0 : i32
    %11 = arith.cmpi ne, %10, %c0_i32_9 : i32
    scf.if %11 {
      %c0_10 = arith.constant 0 : index
      %c0_11 = arith.constant 0 : index
      %12 = vector.load %arg6[%c0_10, %c0_11] : memref<16x32xf32, #tpu.memory_space<vmem>>, vector<16x32xf32>
      %c0_12 = arith.constant 0 : index
      %c0_13 = arith.constant 0 : index
      %13 = vector.load %arg8[%c0_12, %c0_13] : memref<16x32xf32, #tpu.memory_space<vmem>>, vector<16x32xf32>
      %14 = arith.addf %12, %13 : vector<16x32xf32>
      %c0_14 = arith.constant 0 : index
      %c0_15 = arith.constant 0 : index
      %15 = vector.load %arg5[%c0_14, %c0_15] : memref<1x32xf32, #tpu.memory_space<vmem>>, vector<1x32xf32>
      %16 = vector.broadcast %15 : vector<1x32xf32> to vector<16x32xf32>
      %17 = arith.addf %14, %16 : vector<16x32xf32>
      %c0_16 = arith.constant 0 : index
      %c0_17 = arith.constant 0 : index
      %18 = vector.load %arg7[%c0_16, %c0_17] : memref<16x32xf32, #tpu.memory_space<vmem>>, vector<16x32xf32>
      tpu.vector_store %arg7[%c0_16, %c0_17], %17 {strides = array<i32>} : memref<16x32xf32, #tpu.memory_space<vmem>>, vector<16x32xf32>,
    } else {
    }
    return
  }
  func.func @transform_0(%arg0: i32, %arg1: i32, %arg2: i32) -> (i32, i32) {
    %c0_i32 = arith.constant 0 : i32
    return %arg0, %arg2 : i32, i32
  }
  func.func @transform_1(%arg0: i32, %arg1: i32, %arg2: i32) -> (i32, i32) {
    %c0_i32 = arith.constant 0 : i32
    return %arg2, %arg1 : i32, i32
  }
  func.func @transform_2(%arg0: i32, %arg1: i32, %arg2: i32) -> (i32, i32) {
    %c0_i32 = arith.constant 0 : i32
    %c0_i32_0 = arith.constant 0 : i32
    return %c0_i32, %arg1 : i32, i32
  }
  func.func @transform_3(%arg0: i32, %arg1: i32, %arg2: i32) -> (i32, i32) {
    %c0_i32 = arith.constant 0 : i32
    return %arg0, %arg1 : i32, i32
  }
  func.func @transform_4(%arg0: i32, %arg1: i32, %arg2: i32) -> (i32, i32) {
    %c0_i32 = arith.constant 0 : i32
    return %arg0, %arg1 : i32, i32
  }
}

module attributes {stable_mosaic.version = 11 : i64} {
  func.func @kernel(%arg0: i32, %arg1: i32, %arg2: i32, %arg3: memref<1x8x32xbf16, #tpu.memory_space<vmem>>, %arg4: memref<1x8x32xbf16, #tpu.memory_space<vmem>>, %arg5: memref<1x8x32xbf16, #tpu.memory_space<vmem>>, %arg6: memref<1x8x32xbf16, #tpu.memory_space<vmem>>, %arg7: memref<4x8x1xf32, #tpu.memory_space<vmem>>, %arg8: memref<4x8x1xf32, #tpu.memory_space<vmem>>, %arg9: memref<8x32xf32, #tpu.memory_space<vmem>>) attributes {dimension_semantics = [#tpu.dimension_semantics<parallel>, #tpu.dimension_semantics<parallel>, #tpu.dimension_semantics<arbitrary>], iteration_bounds = array<i64: 2, 1, 1>, scalar_prefetch = 0 : i64, scratch_operands = 3 : i64, tpu.core_type = #tpu.core_type<tc>, window_params = [{transform_indices = @transform_0, window_bounds = array<i64: 1, 8, 32>}, {transform_indices = @transform_1, window_bounds = array<i64: 1, 8, 32>}, {transform_indices = @transform_2, window_bounds = array<i64: 1, 8, 32>}, {transform_indices = @transform_3, window_bounds = array<i64: 1, 8, 32>}]} {
    %c8_i32 = arith.constant 8 : i32
    %0 = arith.muli %arg1, %c8_i32 : i32
    %c8_i32_0 = arith.constant 8 : i32
    %1 = arith.muli %arg2, %c8_i32_0 : i32
    %c0_i32 = arith.constant 0 : i32
    %2 = arith.cmpi eq, %arg2, %c0_i32 : i32
    %3 = arith.extui %2 : i1 to i32
    %c0_i32_1 = arith.constant 0 : i32
    %4 = arith.cmpi ne, %3, %c0_i32_1 : i32
    scf.if %4 {
      %cst = arith.constant -1.000000e+30 : f32
      %13 = vector.broadcast %cst : f32 to vector<4x8x1xf32>
      %c0 = arith.constant 0 : index
      %c0_6 = arith.constant 0 : index
      %c0_7 = arith.constant 0 : index
      %14 = vector.load %arg7[%c0, %c0_6, %c0_7] : memref<4x8x1xf32, #tpu.memory_space<vmem>>, vector<4x8x1xf32>
      tpu.vector_store %arg7[%c0, %c0_6, %c0_7], %13 {strides = array<i32>} : memref<4x8x1xf32, #tpu.memory_space<vmem>>, vector<4x8x1xf32>,
      %cst_8 = arith.constant 0.000000e+00 : f32
      %15 = vector.broadcast %cst_8 : f32 to vector<4x8x1xf32>
      %c0_9 = arith.constant 0 : index
      %c0_10 = arith.constant 0 : index
      %c0_11 = arith.constant 0 : index
      %16 = vector.load %arg8[%c0_9, %c0_10, %c0_11] : memref<4x8x1xf32, #tpu.memory_space<vmem>>, vector<4x8x1xf32>
      tpu.vector_store %arg8[%c0_9, %c0_10, %c0_11], %15 {strides = array<i32>} : memref<4x8x1xf32, #tpu.memory_space<vmem>>, vector<4x8x1xf32>,
      %cst_12 = arith.constant 0.000000e+00 : f32
      %17 = vector.broadcast %cst_12 : f32 to vector<8x32xf32>
      %c0_13 = arith.constant 0 : index
      %c0_14 = arith.constant 0 : index
      %18 = vector.load %arg9[%c0_13, %c0_14] : memref<8x32xf32, #tpu.memory_space<vmem>>, vector<8x32xf32>
      tpu.vector_store %arg9[%c0_13, %c0_14], %17 {strides = array<i32>} : memref<8x32xf32, #tpu.memory_space<vmem>>, vector<8x32xf32>,
    } else {
    }
    %c8_i32_2 = arith.constant 8 : i32
    %5 = arith.addi %0, %c8_i32_2 : i32
    %c1_i32 = arith.constant 1 : i32
    %6 = arith.subi %5, %c1_i32 : i32
    %7 = arith.cmpi sle, %1, %6 : i32
    %8 = arith.extui %7 : i1 to i32
    %c0_i32_3 = arith.constant 0 : i32
    %9 = arith.cmpi ne, %8, %c0_i32_3 : i32
    scf.if %9 {
      %13 = tpu.iota {dimensions = array<i32: 0>} : vector<8x8xi32>
      %14 = vector.broadcast %0 : i32 to vector<8x8xi32>
      %15 = arith.addi %14, %13 : vector<8x8xi32>
      %16 = tpu.iota {dimensions = array<i32: 1>} : vector<8x8xi32>
      %17 = vector.broadcast %1 : i32 to vector<8x8xi32>
      %18 = arith.addi %17, %16 : vector<8x8xi32>
      %19 = arith.cmpi sle, %18, %15 : vector<8x8xi32>
      %c0 = arith.constant 0 : index
      %c0_6 = arith.constant 0 : index
      %c0_7 = arith.constant 0 : index
      %20 = vector.load %arg3[%c0, %c0_6, %c0_7] : memref<1x8x32xbf16, #tpu.memory_space<vmem>>, vector<1x8x8xbf16>
      %21 = vector.shape_cast %20 : vector<1x8x8xbf16> to vector<8x8xbf16>
      %22 = arith.extf %21 : vector<8x8xbf16> to vector<8x8xf32>
      %cst = arith.constant 0.353553385 : f32
      %23 = vector.broadcast %cst : f32 to vector<8x8xf32>
      %24 = arith.mulf %22, %23 : vector<8x8xf32>
      %25 = arith.truncf %24 : vector<8x8xf32> to vector<8x8xbf16>
      %c0_8 = arith.constant 0 : index
      %c0_9 = arith.constant 0 : index
      %c0_10 = arith.constant 0 : index
      %26 = vector.load %arg4[%c0_8, %c0_9, %c0_10] : memref<1x8x32xbf16, #tpu.memory_space<vmem>>, vector<1x8x8xbf16>
      %27 = vector.shape_cast %26 : vector<1x8x8xbf16> to vector<8x8xbf16>
      %c0_11 = arith.constant 0 : index
      %c0_12 = arith.constant 0 : index
      %c0_13 = arith.constant 0 : index
      %28 = vector.load %arg5[%c0_11, %c0_12, %c0_13] : memref<1x8x32xbf16, #tpu.memory_space<vmem>>, vector<1x8x8xbf16>
      %29 = vector.shape_cast %28 : vector<1x8x8xbf16> to vector<8x8xbf16>
      %30 = tpu.transpose %27, [1, 0] : vector<8x8xbf16> -> vector<8x8xbf16>
      %cst_14 = arith.constant dense<0.000000e+00> : vector<8x8xf32>
      %31 = tpu.matmul %25, %30, %cst_14 {dimension_numbers = #tpu.dot_dimension_numbers<[1], [0], [0], [1], [0, 0, 1, 1], [], []>} : vector<8x8xbf16>, vector<8x8xbf16>, vector<8x8xf32> -> vector<8x8xf32>
      %cst_15 = arith.constant -1.000000e+30 : f32
      %32 = vector.broadcast %cst_15 : f32 to vector<8x8xf32>
      %33 = arith.select %19, %31, %32 : vector<8x8xi1>, vector<8x8xf32>
      %c0_16 = arith.constant 0 : index
      %c0_17 = arith.constant 0 : index
      %c0_18 = arith.constant 0 : index
      %34 = vector.load %arg7[%c0_16, %c0_17, %c0_18] : memref<4x8x1xf32, #tpu.memory_space<vmem>>, vector<1x8x1xf32>
      %35 = vector.shape_cast %34 : vector<1x8x1xf32> to vector<8x1xf32>
      %c0_19 = arith.constant 0 : index
      %c0_20 = arith.constant 0 : index
      %c0_21 = arith.constant 0 : index
      %36 = vector.load %arg8[%c0_19, %c0_20, %c0_21] : memref<4x8x1xf32, #tpu.memory_space<vmem>>, vector<1x8x1xf32>
      %37 = vector.shape_cast %36 : vector<1x8x1xf32> to vector<8x1xf32>
      %cst_22 = arith.constant dense<0xFF800000> : vector<8xf32>
      %38 = vector.multi_reduction <maximumf>, %33, %cst_22 [1] : vector<8x8xf32> to vector<8xf32>
      %39 = vector.shape_cast %38 : vector<8xf32> to vector<8x1xf32>
      %40 = arith.maximumf %35, %39 : vector<8x1xf32>
      %41 = arith.subf %35, %40 : vector<8x1xf32>
      %42 = math.exp %41 : vector<8x1xf32>
      %43 = vector.broadcast %40 : vector<8x1xf32> to vector<8x8xf32>
      %44 = arith.subf %33, %43 : vector<8x8xf32>
      %45 = math.exp %44 : vector<8x8xf32>
      %46 = arith.mulf %42, %37 : vector<8x1xf32>
      %cst_23 = arith.constant dense<0.000000e+00> : vector<8xf32>
      %47 = vector.multi_reduction <add>, %45, %cst_23 [1] : vector<8x8xf32> to vector<8xf32>
      %48 = vector.shape_cast %47 : vector<8xf32> to vector<8x1xf32>
      %49 = arith.addf %46, %48 : vector<8x1xf32>
      %c0_24 = arith.constant 0 : index
      %c0_25 = arith.constant 0 : index
      %c0_26 = arith.constant 0 : index
      %50 = vector.load %arg8[%c0_24, %c0_25, %c0_26] : memref<4x8x1xf32, #tpu.memory_space<vmem>>, vector<1x8x1xf32>
      %51 = vector.shape_cast %50 : vector<1x8x1xf32> to vector<8x1xf32>
      %52 = vector.shape_cast %49 : vector<8x1xf32> to vector<1x8x1xf32>
      tpu.vector_store %arg8[%c0_24, %c0_25, %c0_26], %52 {strides = array<i32>} : memref<4x8x1xf32, #tpu.memory_space<vmem>>, vector<1x8x1xf32>,
      %c0_27 = arith.constant 0 : index
      %c0_28 = arith.constant 0 : index
      %53 = vector.load %arg9[%c0_27, %c0_28] : memref<8x32xf32, #tpu.memory_space<vmem>>, vector<8x8xf32>
      %54 = vector.broadcast %42 : vector<8x1xf32> to vector<8x8xf32>
      %55 = arith.mulf %54, %53 : vector<8x8xf32>
      %56 = arith.truncf %45 : vector<8x8xf32> to vector<8x8xbf16>
      %cst_29 = arith.constant dense<0.000000e+00> : vector<8x8xf32>
      %57 = tpu.matmul %56, %29, %cst_29 {dimension_numbers = #tpu.dot_dimension_numbers<[1], [0], [0], [1], [0, 0, 1, 1], [], []>} : vector<8x8xbf16>, vector<8x8xbf16>, vector<8x8xf32> -> vector<8x8xf32>
      %58 = arith.addf %55, %57 : vector<8x8xf32>
      %c0_30 = arith.constant 0 : index
      %c0_31 = arith.constant 0 : index
      %59 = vector.load %arg9[%c0_30, %c0_31] : memref<8x32xf32, #tpu.memory_space<vmem>>, vector<8x8xf32>
      tpu.vector_store %arg9[%c0_30, %c0_31], %58 {strides = array<i32>} : memref<8x32xf32, #tpu.memory_space<vmem>>, vector<8x8xf32>,
      %c0_32 = arith.constant 0 : index
      %c0_33 = arith.constant 0 : index
      %c0_34 = arith.constant 0 : index
      %60 = vector.load %arg7[%c0_32, %c0_33, %c0_34] : memref<4x8x1xf32, #tpu.memory_space<vmem>>, vector<1x8x1xf32>
      %61 = vector.shape_cast %60 : vector<1x8x1xf32> to vector<8x1xf32>
      %62 = vector.shape_cast %40 : vector<8x1xf32> to vector<1x8x1xf32>
      tpu.vector_store %arg7[%c0_32, %c0_33, %c0_34], %62 {strides = array<i32>} : memref<4x8x1xf32, #tpu.memory_space<vmem>>, vector<1x8x1xf32>,
      %c0_35 = arith.constant 0 : index
      %c0_36 = arith.constant 0 : index
      %c8 = arith.constant 8 : index
      %63 = vector.load %arg3[%c0_35, %c0_36, %c8] : memref<1x8x32xbf16, #tpu.memory_space<vmem>>, vector<1x8x8xbf16>
      %64 = vector.shape_cast %63 : vector<1x8x8xbf16> to vector<8x8xbf16>
      %65 = arith.extf %64 : vector<8x8xbf16> to vector<8x8xf32>
      %cst_37 = arith.constant 0.353553385 : f32
      %66 = vector.broadcast %cst_37 : f32 to vector<8x8xf32>
      %67 = arith.mulf %65, %66 : vector<8x8xf32>
      %68 = arith.truncf %67 : vector<8x8xf32> to vector<8x8xbf16>
      %c0_38 = arith.constant 0 : index
      %c0_39 = arith.constant 0 : index
      %c8_40 = arith.constant 8 : index
      %69 = vector.load %arg4[%c0_38, %c0_39, %c8_40] : memref<1x8x32xbf16, #tpu.memory_space<vmem>>, vector<1x8x8xbf16>
      %70 = vector.shape_cast %69 : vector<1x8x8xbf16> to vector<8x8xbf16>
      %c0_41 = arith.constant 0 : index
      %c0_42 = arith.constant 0 : index
      %c8_43 = arith.constant 8 : index
      %71 = vector.load %arg5[%c0_41, %c0_42, %c8_43] : memref<1x8x32xbf16, #tpu.memory_space<vmem>>, vector<1x8x8xbf16>
      %72 = vector.shape_cast %71 : vector<1x8x8xbf16> to vector<8x8xbf16>
      %73 = tpu.transpose %70, [1, 0] : vector<8x8xbf16> -> vector<8x8xbf16>
      %cst_44 = arith.constant dense<0.000000e+00> : vector<8x8xf32>
      %74 = tpu.matmul %68, %73, %cst_44 {dimension_numbers = #tpu.dot_dimension_numbers<[1], [0], [0], [1], [0, 0, 1, 1], [], []>} : vector<8x8xbf16>, vector<8x8xbf16>, vector<8x8xf32> -> vector<8x8xf32>
      %cst_45 = arith.constant -1.000000e+30 : f32
      %75 = vector.broadcast %cst_45 : f32 to vector<8x8xf32>
      %76 = arith.select %19, %74, %75 : vector<8x8xi1>, vector<8x8xf32>
      %c1 = arith.constant 1 : index
      %c0_46 = arith.constant 0 : index
      %c0_47 = arith.constant 0 : index
      %77 = vector.load %arg7[%c1, %c0_46, %c0_47] : memref<4x8x1xf32, #tpu.memory_space<vmem>>, vector<1x8x1xf32>
      %78 = vector.shape_cast %77 : vector<1x8x1xf32> to vector<8x1xf32>
      %c1_48 = arith.constant 1 : index
      %c0_49 = arith.constant 0 : index
      %c0_50 = arith.constant 0 : index
      %79 = vector.load %arg8[%c1_48, %c0_49, %c0_50] : memref<4x8x1xf32, #tpu.memory_space<vmem>>, vector<1x8x1xf32>
      %80 = vector.shape_cast %79 : vector<1x8x1xf32> to vector<8x1xf32>
      %cst_51 = arith.constant dense<0xFF800000> : vector<8xf32>
      %81 = vector.multi_reduction <maximumf>, %76, %cst_51 [1] : vector<8x8xf32> to vector<8xf32>
      %82 = vector.shape_cast %81 : vector<8xf32> to vector<8x1xf32>
      %83 = arith.maximumf %78, %82 : vector<8x1xf32>
      %84 = arith.subf %78, %83 : vector<8x1xf32>
      %85 = math.exp %84 : vector<8x1xf32>
      %86 = vector.broadcast %83 : vector<8x1xf32> to vector<8x8xf32>
      %87 = arith.subf %76, %86 : vector<8x8xf32>
      %88 = math.exp %87 : vector<8x8xf32>
      %89 = arith.mulf %85, %80 : vector<8x1xf32>
      %cst_52 = arith.constant dense<0.000000e+00> : vector<8xf32>
      %90 = vector.multi_reduction <add>, %88, %cst_52 [1] : vector<8x8xf32> to vector<8xf32>
      %91 = vector.shape_cast %90 : vector<8xf32> to vector<8x1xf32>
      %92 = arith.addf %89, %91 : vector<8x1xf32>
      %c1_53 = arith.constant 1 : index
      %c0_54 = arith.constant 0 : index
      %c0_55 = arith.constant 0 : index
      %93 = vector.load %arg8[%c1_53, %c0_54, %c0_55] : memref<4x8x1xf32, #tpu.memory_space<vmem>>, vector<1x8x1xf32>
      %94 = vector.shape_cast %93 : vector<1x8x1xf32> to vector<8x1xf32>
      %95 = vector.shape_cast %92 : vector<8x1xf32> to vector<1x8x1xf32>
      tpu.vector_store %arg8[%c1_53, %c0_54, %c0_55], %95 {strides = array<i32>} : memref<4x8x1xf32, #tpu.memory_space<vmem>>, vector<1x8x1xf32>,
      %c0_56 = arith.constant 0 : index
      %c8_57 = arith.constant 8 : index
      %96 = vector.load %arg9[%c0_56, %c8_57] : memref<8x32xf32, #tpu.memory_space<vmem>>, vector<8x8xf32>
      %97 = vector.broadcast %85 : vector<8x1xf32> to vector<8x8xf32>
      %98 = arith.mulf %97, %96 : vector<8x8xf32>
      %99 = arith.truncf %88 : vector<8x8xf32> to vector<8x8xbf16>
      %cst_58 = arith.constant dense<0.000000e+00> : vector<8x8xf32>
      %100 = tpu.matmul %99, %72, %cst_58 {dimension_numbers = #tpu.dot_dimension_numbers<[1], [0], [0], [1], [0, 0, 1, 1], [], []>} : vector<8x8xbf16>, vector<8x8xbf16>, vector<8x8xf32> -> vector<8x8xf32>
      %101 = arith.addf %98, %100 : vector<8x8xf32>
      %c0_59 = arith.constant 0 : index
      %c8_60 = arith.constant 8 : index
      %102 = vector.load %arg9[%c0_59, %c8_60] : memref<8x32xf32, #tpu.memory_space<vmem>>, vector<8x8xf32>
      tpu.vector_store %arg9[%c0_59, %c8_60], %101 {strides = array<i32>} : memref<8x32xf32, #tpu.memory_space<vmem>>, vector<8x8xf32>,
      %c1_61 = arith.constant 1 : index
      %c0_62 = arith.constant 0 : index
      %c0_63 = arith.constant 0 : index
      %103 = vector.load %arg7[%c1_61, %c0_62, %c0_63] : memref<4x8x1xf32, #tpu.memory_space<vmem>>, vector<1x8x1xf32>
      %104 = vector.shape_cast %103 : vector<1x8x1xf32> to vector<8x1xf32>
      %105 = vector.shape_cast %83 : vector<8x1xf32> to vector<1x8x1xf32>
      tpu.vector_store %arg7[%c1_61, %c0_62, %c0_63], %105 {strides = array<i32>} : memref<4x8x1xf32, #tpu.memory_space<vmem>>, vector<1x8x1xf32>,
      %c0_64 = arith.constant 0 : index
      %c0_65 = arith.constant 0 : index
      %c16 = arith.constant 16 : index
      %106 = vector.load %arg3[%c0_64, %c0_65, %c16] : memref<1x8x32xbf16, #tpu.memory_space<vmem>>, vector<1x8x8xbf16>
      %107 = vector.shape_cast %106 : vector<1x8x8xbf16> to vector<8x8xbf16>
      %108 = arith.extf %107 : vector<8x8xbf16> to vector<8x8xf32>
      %cst_66 = arith.constant 0.353553385 : f32
      %109 = vector.broadcast %cst_66 : f32 to vector<8x8xf32>
      %110 = arith.mulf %108, %109 : vector<8x8xf32>
      %111 = arith.truncf %110 : vector<8x8xf32> to vector<8x8xbf16>
      %c0_67 = arith.constant 0 : index
      %c0_68 = arith.constant 0 : index
      %c16_69 = arith.constant 16 : index
      %112 = vector.load %arg4[%c0_67, %c0_68, %c16_69] : memref<1x8x32xbf16, #tpu.memory_space<vmem>>, vector<1x8x8xbf16>
      %113 = vector.shape_cast %112 : vector<1x8x8xbf16> to vector<8x8xbf16>
      %c0_70 = arith.constant 0 : index
      %c0_71 = arith.constant 0 : index
      %c16_72 = arith.constant 16 : index
      %114 = vector.load %arg5[%c0_70, %c0_71, %c16_72] : memref<1x8x32xbf16, #tpu.memory_space<vmem>>, vector<1x8x8xbf16>
      %115 = vector.shape_cast %114 : vector<1x8x8xbf16> to vector<8x8xbf16>
      %116 = tpu.transpose %113, [1, 0] : vector<8x8xbf16> -> vector<8x8xbf16>
      %cst_73 = arith.constant dense<0.000000e+00> : vector<8x8xf32>
      %117 = tpu.matmul %111, %116, %cst_73 {dimension_numbers = #tpu.dot_dimension_numbers<[1], [0], [0], [1], [0, 0, 1, 1], [], []>} : vector<8x8xbf16>, vector<8x8xbf16>, vector<8x8xf32> -> vector<8x8xf32>
      %cst_74 = arith.constant -1.000000e+30 : f32
      %118 = vector.broadcast %cst_74 : f32 to vector<8x8xf32>
      %119 = arith.select %19, %117, %118 : vector<8x8xi1>, vector<8x8xf32>
      %c2 = arith.constant 2 : index
      %c0_75 = arith.constant 0 : index
      %c0_76 = arith.constant 0 : index
      %120 = vector.load %arg7[%c2, %c0_75, %c0_76] : memref<4x8x1xf32, #tpu.memory_space<vmem>>, vector<1x8x1xf32>
      %121 = vector.shape_cast %120 : vector<1x8x1xf32> to vector<8x1xf32>
      %c2_77 = arith.constant 2 : index
      %c0_78 = arith.constant 0 : index
      %c0_79 = arith.constant 0 : index
      %122 = vector.load %arg8[%c2_77, %c0_78, %c0_79] : memref<4x8x1xf32, #tpu.memory_space<vmem>>, vector<1x8x1xf32>
      %123 = vector.shape_cast %122 : vector<1x8x1xf32> to vector<8x1xf32>
      %cst_80 = arith.constant dense<0xFF800000> : vector<8xf32>
      %124 = vector.multi_reduction <maximumf>, %119, %cst_80 [1] : vector<8x8xf32> to vector<8xf32>
      %125 = vector.shape_cast %124 : vector<8xf32> to vector<8x1xf32>
      %126 = arith.maximumf %121, %125 : vector<8x1xf32>
      %127 = arith.subf %121, %126 : vector<8x1xf32>
      %128 = math.exp %127 : vector<8x1xf32>
      %129 = vector.broadcast %126 : vector<8x1xf32> to vector<8x8xf32>
      %130 = arith.subf %119, %129 : vector<8x8xf32>
      %131 = math.exp %130 : vector<8x8xf32>
      %132 = arith.mulf %128, %123 : vector<8x1xf32>
      %cst_81 = arith.constant dense<0.000000e+00> : vector<8xf32>
      %133 = vector.multi_reduction <add>, %131, %cst_81 [1] : vector<8x8xf32> to vector<8xf32>
      %134 = vector.shape_cast %133 : vector<8xf32> to vector<8x1xf32>
      %135 = arith.addf %132, %134 : vector<8x1xf32>
      %c2_82 = arith.constant 2 : index
      %c0_83 = arith.constant 0 : index
      %c0_84 = arith.constant 0 : index
      %136 = vector.load %arg8[%c2_82, %c0_83, %c0_84] : memref<4x8x1xf32, #tpu.memory_space<vmem>>, vector<1x8x1xf32>
      %137 = vector.shape_cast %136 : vector<1x8x1xf32> to vector<8x1xf32>
      %138 = vector.shape_cast %135 : vector<8x1xf32> to vector<1x8x1xf32>
      tpu.vector_store %arg8[%c2_82, %c0_83, %c0_84], %138 {strides = array<i32>} : memref<4x8x1xf32, #tpu.memory_space<vmem>>, vector<1x8x1xf32>,
      %c0_85 = arith.constant 0 : index
      %c16_86 = arith.constant 16 : index
      %139 = vector.load %arg9[%c0_85, %c16_86] : memref<8x32xf32, #tpu.memory_space<vmem>>, vector<8x8xf32>
      %140 = vector.broadcast %128 : vector<8x1xf32> to vector<8x8xf32>
      %141 = arith.mulf %140, %139 : vector<8x8xf32>
      %142 = arith.truncf %131 : vector<8x8xf32> to vector<8x8xbf16>
      %cst_87 = arith.constant dense<0.000000e+00> : vector<8x8xf32>
      %143 = tpu.matmul %142, %115, %cst_87 {dimension_numbers = #tpu.dot_dimension_numbers<[1], [0], [0], [1], [0, 0, 1, 1], [], []>} : vector<8x8xbf16>, vector<8x8xbf16>, vector<8x8xf32> -> vector<8x8xf32>
      %144 = arith.addf %141, %143 : vector<8x8xf32>
      %c0_88 = arith.constant 0 : index
      %c16_89 = arith.constant 16 : index
      %145 = vector.load %arg9[%c0_88, %c16_89] : memref<8x32xf32, #tpu.memory_space<vmem>>, vector<8x8xf32>
      tpu.vector_store %arg9[%c0_88, %c16_89], %144 {strides = array<i32>} : memref<8x32xf32, #tpu.memory_space<vmem>>, vector<8x8xf32>,
      %c2_90 = arith.constant 2 : index
      %c0_91 = arith.constant 0 : index
      %c0_92 = arith.constant 0 : index
      %146 = vector.load %arg7[%c2_90, %c0_91, %c0_92] : memref<4x8x1xf32, #tpu.memory_space<vmem>>, vector<1x8x1xf32>
      %147 = vector.shape_cast %146 : vector<1x8x1xf32> to vector<8x1xf32>
      %148 = vector.shape_cast %126 : vector<8x1xf32> to vector<1x8x1xf32>
      tpu.vector_store %arg7[%c2_90, %c0_91, %c0_92], %148 {strides = array<i32>} : memref<4x8x1xf32, #tpu.memory_space<vmem>>, vector<1x8x1xf32>,
      %c0_93 = arith.constant 0 : index
      %c0_94 = arith.constant 0 : index
      %c24 = arith.constant 24 : index
      %149 = vector.load %arg3[%c0_93, %c0_94, %c24] : memref<1x8x32xbf16, #tpu.memory_space<vmem>>, vector<1x8x8xbf16>
      %150 = vector.shape_cast %149 : vector<1x8x8xbf16> to vector<8x8xbf16>
      %151 = arith.extf %150 : vector<8x8xbf16> to vector<8x8xf32>
      %cst_95 = arith.constant 0.353553385 : f32
      %152 = vector.broadcast %cst_95 : f32 to vector<8x8xf32>
      %153 = arith.mulf %151, %152 : vector<8x8xf32>
      %154 = arith.truncf %153 : vector<8x8xf32> to vector<8x8xbf16>
      %c0_96 = arith.constant 0 : index
      %c0_97 = arith.constant 0 : index
      %c24_98 = arith.constant 24 : index
      %155 = vector.load %arg4[%c0_96, %c0_97, %c24_98] : memref<1x8x32xbf16, #tpu.memory_space<vmem>>, vector<1x8x8xbf16>
      %156 = vector.shape_cast %155 : vector<1x8x8xbf16> to vector<8x8xbf16>
      %c0_99 = arith.constant 0 : index
      %c0_100 = arith.constant 0 : index
      %c24_101 = arith.constant 24 : index
      %157 = vector.load %arg5[%c0_99, %c0_100, %c24_101] : memref<1x8x32xbf16, #tpu.memory_space<vmem>>, vector<1x8x8xbf16>
      %158 = vector.shape_cast %157 : vector<1x8x8xbf16> to vector<8x8xbf16>
      %159 = tpu.transpose %156, [1, 0] : vector<8x8xbf16> -> vector<8x8xbf16>
      %cst_102 = arith.constant dense<0.000000e+00> : vector<8x8xf32>
      %160 = tpu.matmul %154, %159, %cst_102 {dimension_numbers = #tpu.dot_dimension_numbers<[1], [0], [0], [1], [0, 0, 1, 1], [], []>} : vector<8x8xbf16>, vector<8x8xbf16>, vector<8x8xf32> -> vector<8x8xf32>
      %cst_103 = arith.constant -1.000000e+30 : f32
      %161 = vector.broadcast %cst_103 : f32 to vector<8x8xf32>
      %162 = arith.select %19, %160, %161 : vector<8x8xi1>, vector<8x8xf32>
      %c3 = arith.constant 3 : index
      %c0_104 = arith.constant 0 : index
      %c0_105 = arith.constant 0 : index
      %163 = vector.load %arg7[%c3, %c0_104, %c0_105] : memref<4x8x1xf32, #tpu.memory_space<vmem>>, vector<1x8x1xf32>
      %164 = vector.shape_cast %163 : vector<1x8x1xf32> to vector<8x1xf32>
      %c3_106 = arith.constant 3 : index
      %c0_107 = arith.constant 0 : index
      %c0_108 = arith.constant 0 : index
      %165 = vector.load %arg8[%c3_106, %c0_107, %c0_108] : memref<4x8x1xf32, #tpu.memory_space<vmem>>, vector<1x8x1xf32>
      %166 = vector.shape_cast %165 : vector<1x8x1xf32> to vector<8x1xf32>
      %cst_109 = arith.constant dense<0xFF800000> : vector<8xf32>
      %167 = vector.multi_reduction <maximumf>, %162, %cst_109 [1] : vector<8x8xf32> to vector<8xf32>
      %168 = vector.shape_cast %167 : vector<8xf32> to vector<8x1xf32>
      %169 = arith.maximumf %164, %168 : vector<8x1xf32>
      %170 = arith.subf %164, %169 : vector<8x1xf32>
      %171 = math.exp %170 : vector<8x1xf32>
      %172 = vector.broadcast %169 : vector<8x1xf32> to vector<8x8xf32>
      %173 = arith.subf %162, %172 : vector<8x8xf32>
      %174 = math.exp %173 : vector<8x8xf32>
      %175 = arith.mulf %171, %166 : vector<8x1xf32>
      %cst_110 = arith.constant dense<0.000000e+00> : vector<8xf32>
      %176 = vector.multi_reduction <add>, %174, %cst_110 [1] : vector<8x8xf32> to vector<8xf32>
      %177 = vector.shape_cast %176 : vector<8xf32> to vector<8x1xf32>
      %178 = arith.addf %175, %177 : vector<8x1xf32>
      %c3_111 = arith.constant 3 : index
      %c0_112 = arith.constant 0 : index
      %c0_113 = arith.constant 0 : index
      %179 = vector.load %arg8[%c3_111, %c0_112, %c0_113] : memref<4x8x1xf32, #tpu.memory_space<vmem>>, vector<1x8x1xf32>
      %180 = vector.shape_cast %179 : vector<1x8x1xf32> to vector<8x1xf32>
      %181 = vector.shape_cast %178 : vector<8x1xf32> to vector<1x8x1xf32>
      tpu.vector_store %arg8[%c3_111, %c0_112, %c0_113], %181 {strides = array<i32>} : memref<4x8x1xf32, #tpu.memory_space<vmem>>, vector<1x8x1xf32>,
      %c0_114 = arith.constant 0 : index
      %c24_115 = arith.constant 24 : index
      %182 = vector.load %arg9[%c0_114, %c24_115] : memref<8x32xf32, #tpu.memory_space<vmem>>, vector<8x8xf32>
      %183 = vector.broadcast %171 : vector<8x1xf32> to vector<8x8xf32>
      %184 = arith.mulf %183, %182 : vector<8x8xf32>
      %185 = arith.truncf %174 : vector<8x8xf32> to vector<8x8xbf16>
      %cst_116 = arith.constant dense<0.000000e+00> : vector<8x8xf32>
      %186 = tpu.matmul %185, %158, %cst_116 {dimension_numbers = #tpu.dot_dimension_numbers<[1], [0], [0], [1], [0, 0, 1, 1], [], []>} : vector<8x8xbf16>, vector<8x8xbf16>, vector<8x8xf32> -> vector<8x8xf32>
      %187 = arith.addf %184, %186 : vector<8x8xf32>
      %c0_117 = arith.constant 0 : index
      %c24_118 = arith.constant 24 : index
      %188 = vector.load %arg9[%c0_117, %c24_118] : memref<8x32xf32, #tpu.memory_space<vmem>>, vector<8x8xf32>
      tpu.vector_store %arg9[%c0_117, %c24_118], %187 {strides = array<i32>} : memref<8x32xf32, #tpu.memory_space<vmem>>, vector<8x8xf32>,
      %c3_119 = arith.constant 3 : index
      %c0_120 = arith.constant 0 : index
      %c0_121 = arith.constant 0 : index
      %189 = vector.load %arg7[%c3_119, %c0_120, %c0_121] : memref<4x8x1xf32, #tpu.memory_space<vmem>>, vector<1x8x1xf32>
      %190 = vector.shape_cast %189 : vector<1x8x1xf32> to vector<8x1xf32>
      %191 = vector.shape_cast %169 : vector<8x1xf32> to vector<1x8x1xf32>
      tpu.vector_store %arg7[%c3_119, %c0_120, %c0_121], %191 {strides = array<i32>} : memref<4x8x1xf32, #tpu.memory_space<vmem>>, vector<1x8x1xf32>,
    } else {
    }
    %c0_i32_4 = arith.constant 0 : i32
    %10 = arith.cmpi eq, %arg2, %c0_i32_4 : i32
    %11 = arith.extui %10 : i1 to i32
    %c0_i32_5 = arith.constant 0 : i32
    %12 = arith.cmpi ne, %11, %c0_i32_5 : i32
    scf.if %12 {
      %c0 = arith.constant 0 : index
      %c0_6 = arith.constant 0 : index
      %c0_7 = arith.constant 0 : index
      %13 = vector.load %arg8[%c0, %c0_6, %c0_7] : memref<4x8x1xf32, #tpu.memory_space<vmem>>, vector<1x8x1xf32>
      %14 = vector.shape_cast %13 : vector<1x8x1xf32> to vector<8x1xf32>
      %15 = tpu.reciprocal %14 {approx = true} : vector<8x1xf32> -> vector<8x1xf32>
      %c0_8 = arith.constant 0 : index
      %c0_9 = arith.constant 0 : index
      %16 = vector.load %arg9[%c0_8, %c0_9] : memref<8x32xf32, #tpu.memory_space<vmem>>, vector<8x8xf32>
      %17 = vector.broadcast %15 : vector<8x1xf32> to vector<8x8xf32>
      %18 = arith.mulf %16, %17 : vector<8x8xf32>
      %19 = arith.truncf %18 : vector<8x8xf32> to vector<8x8xbf16>
      %c0_10 = arith.constant 0 : index
      %c0_11 = arith.constant 0 : index
      %c0_12 = arith.constant 0 : index
      %20 = vector.load %arg6[%c0_10, %c0_11, %c0_12] : memref<1x8x32xbf16, #tpu.memory_space<vmem>>, vector<1x8x8xbf16>
      %21 = vector.shape_cast %20 : vector<1x8x8xbf16> to vector<8x8xbf16>
      %22 = vector.shape_cast %19 : vector<8x8xbf16> to vector<1x8x8xbf16>
      tpu.vector_store %arg6[%c0_10, %c0_11, %c0_12], %22 {strides = array<i32>} : memref<1x8x32xbf16, #tpu.memory_space<vmem>>, vector<1x8x8xbf16>,
      %c1 = arith.constant 1 : index
      %c0_13 = arith.constant 0 : index
      %c0_14 = arith.constant 0 : index
      %23 = vector.load %arg8[%c1, %c0_13, %c0_14] : memref<4x8x1xf32, #tpu.memory_space<vmem>>, vector<1x8x1xf32>
      %24 = vector.shape_cast %23 : vector<1x8x1xf32> to vector<8x1xf32>
      %25 = tpu.reciprocal %24 {approx = true} : vector<8x1xf32> -> vector<8x1xf32>
      %c0_15 = arith.constant 0 : index
      %c8 = arith.constant 8 : index
      %26 = vector.load %arg9[%c0_15, %c8] : memref<8x32xf32, #tpu.memory_space<vmem>>, vector<8x8xf32>
      %27 = vector.broadcast %25 : vector<8x1xf32> to vector<8x8xf32>
      %28 = arith.mulf %26, %27 : vector<8x8xf32>
      %29 = arith.truncf %28 : vector<8x8xf32> to vector<8x8xbf16>
      %c0_16 = arith.constant 0 : index
      %c0_17 = arith.constant 0 : index
      %c8_18 = arith.constant 8 : index
      %30 = vector.load %arg6[%c0_16, %c0_17, %c8_18] : memref<1x8x32xbf16, #tpu.memory_space<vmem>>, vector<1x8x8xbf16>
      %31 = vector.shape_cast %30 : vector<1x8x8xbf16> to vector<8x8xbf16>
      %32 = vector.shape_cast %29 : vector<8x8xbf16> to vector<1x8x8xbf16>
      tpu.vector_store %arg6[%c0_16, %c0_17, %c8_18], %32 {strides = array<i32>} : memref<1x8x32xbf16, #tpu.memory_space<vmem>>, vector<1x8x8xbf16>,
      %c2 = arith.constant 2 : index
      %c0_19 = arith.constant 0 : index
      %c0_20 = arith.constant 0 : index
      %33 = vector.load %arg8[%c2, %c0_19, %c0_20] : memref<4x8x1xf32, #tpu.memory_space<vmem>>, vector<1x8x1xf32>
      %34 = vector.shape_cast %33 : vector<1x8x1xf32> to vector<8x1xf32>
      %35 = tpu.reciprocal %34 {approx = true} : vector<8x1xf32> -> vector<8x1xf32>
      %c0_21 = arith.constant 0 : index
      %c16 = arith.constant 16 : index
      %36 = vector.load %arg9[%c0_21, %c16] : memref<8x32xf32, #tpu.memory_space<vmem>>, vector<8x8xf32>
      %37 = vector.broadcast %35 : vector<8x1xf32> to vector<8x8xf32>
      %38 = arith.mulf %36, %37 : vector<8x8xf32>
      %39 = arith.truncf %38 : vector<8x8xf32> to vector<8x8xbf16>
      %c0_22 = arith.constant 0 : index
      %c0_23 = arith.constant 0 : index
      %c16_24 = arith.constant 16 : index
      %40 = vector.load %arg6[%c0_22, %c0_23, %c16_24] : memref<1x8x32xbf16, #tpu.memory_space<vmem>>, vector<1x8x8xbf16>
      %41 = vector.shape_cast %40 : vector<1x8x8xbf16> to vector<8x8xbf16>
      %42 = vector.shape_cast %39 : vector<8x8xbf16> to vector<1x8x8xbf16>
      tpu.vector_store %arg6[%c0_22, %c0_23, %c16_24], %42 {strides = array<i32>} : memref<1x8x32xbf16, #tpu.memory_space<vmem>>, vector<1x8x8xbf16>,
      %c3 = arith.constant 3 : index
      %c0_25 = arith.constant 0 : index
      %c0_26 = arith.constant 0 : index
      %43 = vector.load %arg8[%c3, %c0_25, %c0_26] : memref<4x8x1xf32, #tpu.memory_space<vmem>>, vector<1x8x1xf32>
      %44 = vector.shape_cast %43 : vector<1x8x1xf32> to vector<8x1xf32>
      %45 = tpu.reciprocal %44 {approx = true} : vector<8x1xf32> -> vector<8x1xf32>
      %c0_27 = arith.constant 0 : index
      %c24 = arith.constant 24 : index
      %46 = vector.load %arg9[%c0_27, %c24] : memref<8x32xf32, #tpu.memory_space<vmem>>, vector<8x8xf32>
      %47 = vector.broadcast %45 : vector<8x1xf32> to vector<8x8xf32>
      %48 = arith.mulf %46, %47 : vector<8x8xf32>
      %49 = arith.truncf %48 : vector<8x8xf32> to vector<8x8xbf16>
      %c0_28 = arith.constant 0 : index
      %c0_29 = arith.constant 0 : index
      %c24_30 = arith.constant 24 : index
      %50 = vector.load %arg6[%c0_28, %c0_29, %c24_30] : memref<1x8x32xbf16, #tpu.memory_space<vmem>>, vector<1x8x8xbf16>
      %51 = vector.shape_cast %50 : vector<1x8x8xbf16> to vector<8x8xbf16>
      %52 = vector.shape_cast %49 : vector<8x8xbf16> to vector<1x8x8xbf16>
      tpu.vector_store %arg6[%c0_28, %c0_29, %c24_30], %52 {strides = array<i32>} : memref<1x8x32xbf16, #tpu.memory_space<vmem>>, vector<1x8x8xbf16>,
    } else {
    }
    return
  }
  func.func @transform_0(%arg0: i32, %arg1: i32, %arg2: i32) -> (i32, i32, i32) {
    %c0_i32 = arith.constant 0 : i32
    %c0_i32_0 = arith.constant 0 : i32
    return %arg0, %arg1, %c0_i32 : i32, i32, i32
  }
  func.func @transform_1(%arg0: i32, %arg1: i32, %arg2: i32) -> (i32, i32, i32) {
    %c0_i32 = arith.constant 0 : i32
    %c0_i32_0 = arith.constant 0 : i32
    return %arg0, %arg2, %c0_i32 : i32, i32, i32
  }
  func.func @transform_2(%arg0: i32, %arg1: i32, %arg2: i32) -> (i32, i32, i32) {
    %c0_i32 = arith.constant 0 : i32
    %c0_i32_0 = arith.constant 0 : i32
    return %arg0, %arg2, %c0_i32 : i32, i32, i32
  }
  func.func @transform_3(%arg0: i32, %arg1: i32, %arg2: i32) -> (i32, i32, i32) {
    %c0_i32 = arith.constant 0 : i32
    %c0_i32_0 = arith.constant 0 : i32
    return %arg0, %arg1, %c0_i32 : i32, i32, i32
  }
}

module attributes {stable_mosaic.version = 11 : i64} {
  func.func @kernel(%arg0: i32, %arg1: i32, %arg2: i32, %arg3: memref<16x128xbf16, #tpu.memory_space<vmem>>, %arg4: memref<128x32xbf16, #tpu.memory_space<vmem>>, %arg5: memref<1x32xf32, #tpu.memory_space<vmem>>, %arg6: memref<16x32xf32, #tpu.memory_space<vmem>>, %arg7: memref<16x32xf32, #tpu.memory_space<vmem>>, %arg8: memref<16x32xf32, #tpu.memory_space<vmem>>) attributes {dimension_semantics = [#tpu.dimension_semantics<parallel>, #tpu.dimension_semantics<parallel>, #tpu.dimension_semantics<arbitrary>], iteration_bounds = array<i64: 1, 1, 1>, scalar_prefetch = 0 : i64, scratch_operands = 1 : i64, tpu.core_type = #tpu.core_type<tc>, window_params = [{transform_indices = @transform_0, window_bounds = array<i64: 16, 128>}, {transform_indices = @transform_1, window_bounds = array<i64: 128, 32>}, {transform_indices = @transform_2, window_bounds = array<i64: 1, 32>}, {transform_indices = @transform_3, window_bounds = array<i64: 16, 32>}, {transform_indices = @transform_4, window_bounds = array<i64: 16, 32>}]} {
    %c0_i32 = arith.constant 0 : i32
    %0 = arith.cmpi eq, %arg2, %c0_i32 : i32
    %1 = arith.extui %0 : i1 to i32
    %c0_i32_0 = arith.constant 0 : i32
    %2 = arith.cmpi ne, %1, %c0_i32_0 : i32
    scf.if %2 {
      %cst_10 = arith.constant 0.000000e+00 : f32
      %12 = vector.broadcast %cst_10 : f32 to vector<16x32xf32>
      %c0_11 = arith.constant 0 : index
      %c0_12 = arith.constant 0 : index
      %13 = vector.load %arg8[%c0_11, %c0_12] : memref<16x32xf32, #tpu.memory_space<vmem>>, vector<16x32xf32>
      tpu.vector_store %arg8[%c0_11, %c0_12], %12 {strides = array<i32>} : memref<16x32xf32, #tpu.memory_space<vmem>>, vector<16x32xf32>,
    } else {
    }
    %c0 = arith.constant 0 : index
    %c0_1 = arith.constant 0 : index
    %3 = vector.load %arg8[%c0, %c0_1] : memref<16x32xf32, #tpu.memory_space<vmem>>, vector<16x32xf32>
    %c0_2 = arith.constant 0 : index
    %c0_3 = arith.constant 0 : index
    %4 = vector.load %arg3[%c0_2, %c0_3] : memref<16x128xbf16, #tpu.memory_space<vmem>>, vector<16x128xbf16>
    %c0_4 = arith.constant 0 : index
    %c0_5 = arith.constant 0 : index
    %5 = vector.load %arg4[%c0_4, %c0_5] : memref<128x32xbf16, #tpu.memory_space<vmem>>, vector<128x32xbf16>
    %cst = arith.constant dense<0.000000e+00> : vector<16x32xf32>
    %6 = tpu.matmul %4, %5, %cst {dimension_numbers = #tpu.dot_dimension_numbers<[1], [0], [0], [1], [0, 0, 1, 1], [], []>} : vector<16x128xbf16>, vector<128x32xbf16>, vector<16x32xf32> -> vector<16x32xf32>
    %7 = arith.addf %3, %6 : vector<16x32xf32>
    %c0_6 = arith.constant 0 : index
    %c0_7 = arith.constant 0 : index
    %8 = vector.load %arg8[%c0_6, %c0_7] : memref<16x32xf32, #tpu.memory_space<vmem>>, vector<16x32xf32>
    tpu.vector_store %arg8[%c0_6, %c0_7], %7 {strides = array<i32>} : memref<16x32xf32, #tpu.memory_space<vmem>>, vector<16x32xf32>,
    %c0_i32_8 = arith.constant 0 : i32
    %9 = arith.cmpi eq, %arg2, %c0_i32_8 : i32
    %10 = arith.extui %9 : i1 to i32
    %c0_i32_9 = arith.constant 0 : i32
    %11 = arith.cmpi ne, %10, %c0_i32_9 : i32
    scf.if %11 {
      %c0_10 = arith.constant 0 : index
      %c0_11 = arith.constant 0 : index
      %12 = vector.load %arg6[%c0_10, %c0_11] : memref<16x32xf32, #tpu.memory_space<vmem>>, vector<16x32xf32>
      %c0_12 = arith.constant 0 : index
      %c0_13 = arith.constant 0 : index
      %13 = vector.load %arg8[%c0_12, %c0_13] : memref<16x32xf32, #tpu.memory_space<vmem>>, vector<16x32xf32>
      %14 = arith.addf %12, %13 : vector<16x32xf32>
      %c0_14 = arith.constant 0 : index
      %c0_15 = arith.constant 0 : index
      %15 = vector.load %arg5[%c0_14, %c0_15] : memref<1x32xf32, #tpu.memory_space<vmem>>, vector<1x32xf32>
      %16 = vector.broadcast %15 : vector<1x32xf32> to vector<16x32xf32>
      %17 = arith.addf %14, %16 : vector<16x32xf32>
      %c0_16 = arith.constant 0 : index
      %c0_17 = arith.constant 0 : index
      %18 = vector.load %arg7[%c0_16, %c0_17] : memref<16x32xf32, #tpu.memory_space<vmem>>, vector<16x32xf32>
      tpu.vector_store %arg7[%c0_16, %c0_17], %17 {strides = array<i32>} : memref<16x32xf32, #tpu.memory_space<vmem>>, vector<16x32xf32>,
    } else {
    }
    return
  }
  func.func @transform_0(%arg0: i32, %arg1: i32, %arg2: i32) -> (i32, i32) {
    %c0_i32 = arith.constant 0 : i32
    return %arg0, %arg2 : i32, i32
  }
  func.func @transform_1(%arg0: i32, %arg1: i32, %arg2: i32) -> (i32, i32) {
    %c0_i32 = arith.constant 0 : i32
    return %arg2, %arg1 : i32, i32
  }
  func.func @transform_2(%arg0: i32, %arg1: i32, %arg2: i32) -> (i32, i32) {
    %c0_i32 = arith.constant 0 : i32
    %c0_i32_0 = arith.constant 0 : i32
    return %c0_i32, %arg1 : i32, i32
  }
  func.func @transform_3(%arg0: i32, %arg1: i32, %arg2: i32) -> (i32, i32) {
    %c0_i32 = arith.constant 0 : i32
    return %arg0, %arg1 : i32, i32
  }
  func.func @transform_4(%arg0: i32, %arg1: i32, %arg2: i32) -> (i32, i32) {
    %c0_i32 = arith.constant 0 : i32
    return %arg0, %arg1 : i32, i32
  }
}

module attributes {stable_mosaic.version = 11 : i64} {
  func.func @kernel(%arg0: i32, %arg1: i32, %arg2: memref<16x32xf32, #tpu.memory_space<vmem>>, %arg3: memref<1x32xf32, #tpu.memory_space<vmem>>, %arg4: memref<1x32xf32, #tpu.memory_space<vmem>>, %arg5: memref<32x64xbf16, #tpu.memory_space<vmem>>, %arg6: memref<16x64xf32, #tpu.memory_space<vmem>>) attributes {dimension_semantics = [#tpu.dimension_semantics<parallel>, #tpu.dimension_semantics<parallel>], iteration_bounds = array<i64: 1, 1>, scalar_prefetch = 0 : i64, scratch_operands = 0 : i64, tpu.core_type = #tpu.core_type<tc>, window_params = [{transform_indices = @transform_0, window_bounds = array<i64: 16, 32>}, {pipeline_mode = #tpu.pipeline_mode<synchronous>, transform_indices = @transform_1, window_bounds = array<i64: 1, 32>}, {pipeline_mode = #tpu.pipeline_mode<synchronous>, transform_indices = @transform_2, window_bounds = array<i64: 1, 32>}, {transform_indices = @transform_3, window_bounds = array<i64: 32, 64>}, {transform_indices = @transform_4, window_bounds = array<i64: 16, 64>}]} {
    %c0 = arith.constant 0 : index
    %c0_0 = arith.constant 0 : index
    %0 = vector.load %arg2[%c0, %c0_0] : memref<16x32xf32, #tpu.memory_space<vmem>>, vector<16x32xf32>
    %cst = arith.constant dense<0.000000e+00> : vector<16xf32>
    %1 = vector.multi_reduction <add>, %0, %cst [1] : vector<16x32xf32> to vector<16xf32>
    %2 = vector.shape_cast %1 : vector<16xf32> to vector<16x1xf32>
    %cst_1 = arith.constant 3.200000e+01 : f32
    %3 = vector.broadcast %cst_1 : f32 to vector<16x1xf32>
    %4 = arith.divf %2, %3 : vector<16x1xf32>
    %5 = vector.broadcast %4 : vector<16x1xf32> to vector<16x32xf32>
    %6 = arith.subf %0, %5 : vector<16x32xf32>
    %7 = arith.mulf %6, %6 : vector<16x32xf32>
    %cst_2 = arith.constant dense<0.000000e+00> : vector<16xf32>
    %8 = vector.multi_reduction <add>, %7, %cst_2 [1] : vector<16x32xf32> to vector<16xf32>
    %9 = vector.shape_cast %8 : vector<16xf32> to vector<16x1xf32>
    %cst_3 = arith.constant 3.200000e+01 : f32
    %10 = vector.broadcast %cst_3 : f32 to vector<16x1xf32>
    %11 = arith.divf %9, %10 : vector<16x1xf32>
    %12 = vector.broadcast %4 : vector<16x1xf32> to vector<16x32xf32>
    %13 = arith.subf %0, %12 : vector<16x32xf32>
    %cst_4 = arith.constant 9.99999974E-6 : f32
    %14 = vector.broadcast %cst_4 : f32 to vector<16x1xf32>
    %15 = arith.addf %11, %14 : vector<16x1xf32>
    %16 = math.rsqrt %15 : vector<16x1xf32>
    %17 = vector.broadcast %16 : vector<16x1xf32> to vector<16x32xf32>
    %18 = arith.mulf %13, %17 : vector<16x32xf32>
    %c0_5 = arith.constant 0 : index
    %c0_6 = arith.constant 0 : index
    %19 = vector.load %arg3[%c0_5, %c0_6] : memref<1x32xf32, #tpu.memory_space<vmem>>, vector<1x32xf32>
    %20 = vector.broadcast %19 : vector<1x32xf32> to vector<16x32xf32>
    %21 = arith.mulf %18, %20 : vector<16x32xf32>
    %c0_7 = arith.constant 0 : index
    %c0_8 = arith.constant 0 : index
    %22 = vector.load %arg4[%c0_7, %c0_8] : memref<1x32xf32, #tpu.memory_space<vmem>>, vector<1x32xf32>
    %23 = vector.broadcast %22 : vector<1x32xf32> to vector<16x32xf32>
    %24 = arith.addf %21, %23 : vector<16x32xf32>
    %25 = arith.truncf %24 : vector<16x32xf32> to vector<16x32xbf16>
    %c0_9 = arith.constant 0 : index
    %c0_10 = arith.constant 0 : index
    %26 = vector.load %arg5[%c0_9, %c0_10] : memref<32x64xbf16, #tpu.memory_space<vmem>>, vector<32x64xbf16>
    %cst_11 = arith.constant dense<0.000000e+00> : vector<16x64xf32>
    %27 = tpu.matmul %25, %26, %cst_11 {dimension_numbers = #tpu.dot_dimension_numbers<[1], [0], [0], [1], [0, 0, 1, 1], [], []>} : vector<16x32xbf16>, vector<32x64xbf16>, vector<16x64xf32> -> vector<16x64xf32>
    %c0_12 = arith.constant 0 : index
    %c0_13 = arith.constant 0 : index
    %28 = vector.load %arg6[%c0_12, %c0_13] : memref<16x64xf32, #tpu.memory_space<vmem>>, vector<16x64xf32>
    tpu.vector_store %arg6[%c0_12, %c0_13], %27 {strides = array<i32>} : memref<16x64xf32, #tpu.memory_space<vmem>>, vector<16x64xf32>,
    return
  }
  func.func @transform_0(%arg0: i32, %arg1: i32) -> (i32, i32) {
    %c0_i32 = arith.constant 0 : i32
    %c0_i32_0 = arith.constant 0 : i32
    return %arg0, %c0_i32 : i32, i32
  }
  func.func @transform_1(%arg0: i32, %arg1: i32) -> (i32, i32) {
    %c0_i32 = arith.constant 0 : i32
    %c0_i32_0 = arith.constant 0 : i32
    %c0_i32_1 = arith.constant 0 : i32
    return %c0_i32, %c0_i32_0 : i32, i32
  }
  func.func @transform_2(%arg0: i32, %arg1: i32) -> (i32, i32) {
    %c0_i32 = arith.constant 0 : i32
    %c0_i32_0 = arith.constant 0 : i32
    %c0_i32_1 = arith.constant 0 : i32
    return %c0_i32, %c0_i32_0 : i32, i32
  }
  func.func @transform_3(%arg0: i32, %arg1: i32) -> (i32, i32) {
    %c0_i32 = arith.constant 0 : i32
    %c0_i32_0 = arith.constant 0 : i32
    return %c0_i32, %arg1 : i32, i32
  }
  func.func @transform_4(%arg0: i32, %arg1: i32) -> (i32, i32) {
    %c0_i32 = arith.constant 0 : i32
    return %arg0, %arg1 : i32, i32
  }
}

module attributes {stable_mosaic.version = 11 : i64} {
  func.func @kernel(%arg0: i32, %arg1: i32, %arg2: memref<16x32xf32, #tpu.memory_space<vmem>>, %arg3: memref<1x32xf32, #tpu.memory_space<vmem>>, %arg4: memref<1x32xf32, #tpu.memory_space<vmem>>, %arg5: memref<32x1xbf16, #tpu.memory_space<vmem>>, %arg6: memref<1x1xf32, #tpu.memory_space<vmem>>, %arg7: memref<16x1xf32, #tpu.memory_space<vmem>>) attributes {dimension_semantics = [#tpu.dimension_semantics<parallel>, #tpu.dimension_semantics<parallel>], iteration_bounds = array<i64: 1, 1>, scalar_prefetch = 0 : i64, scratch_operands = 0 : i64, tpu.core_type = #tpu.core_type<tc>, window_params = [{transform_indices = @transform_0, window_bounds = array<i64: 16, 32>}, {pipeline_mode = #tpu.pipeline_mode<synchronous>, transform_indices = @transform_1, window_bounds = array<i64: 1, 32>}, {pipeline_mode = #tpu.pipeline_mode<synchronous>, transform_indices = @transform_2, window_bounds = array<i64: 1, 32>}, {transform_indices = @transform_3, window_bounds = array<i64: 32, 1>}, {transform_indices = @transform_4, window_bounds = array<i64: 1, 1>}, {transform_indices = @transform_5, window_bounds = array<i64: 16, 1>}]} {
    %c0 = arith.constant 0 : index
    %c0_0 = arith.constant 0 : index
    %0 = vector.load %arg2[%c0, %c0_0] : memref<16x32xf32, #tpu.memory_space<vmem>>, vector<16x32xf32>
    %cst = arith.constant dense<0.000000e+00> : vector<16xf32>
    %1 = vector.multi_reduction <add>, %0, %cst [1] : vector<16x32xf32> to vector<16xf32>
    %2 = vector.shape_cast %1 : vector<16xf32> to vector<16x1xf32>
    %cst_1 = arith.constant 3.200000e+01 : f32
    %3 = vector.broadcast %cst_1 : f32 to vector<16x1xf32>
    %4 = arith.divf %2, %3 : vector<16x1xf32>
    %5 = vector.broadcast %4 : vector<16x1xf32> to vector<16x32xf32>
    %6 = arith.subf %0, %5 : vector<16x32xf32>
    %7 = arith.mulf %6, %6 : vector<16x32xf32>
    %cst_2 = arith.constant dense<0.000000e+00> : vector<16xf32>
    %8 = vector.multi_reduction <add>, %7, %cst_2 [1] : vector<16x32xf32> to vector<16xf32>
    %9 = vector.shape_cast %8 : vector<16xf32> to vector<16x1xf32>
    %cst_3 = arith.constant 3.200000e+01 : f32
    %10 = vector.broadcast %cst_3 : f32 to vector<16x1xf32>
    %11 = arith.divf %9, %10 : vector<16x1xf32>
    %12 = vector.broadcast %4 : vector<16x1xf32> to vector<16x32xf32>
    %13 = arith.subf %0, %12 : vector<16x32xf32>
    %cst_4 = arith.constant 9.99999974E-6 : f32
    %14 = vector.broadcast %cst_4 : f32 to vector<16x1xf32>
    %15 = arith.addf %11, %14 : vector<16x1xf32>
    %16 = math.rsqrt %15 : vector<16x1xf32>
    %17 = vector.broadcast %16 : vector<16x1xf32> to vector<16x32xf32>
    %18 = arith.mulf %13, %17 : vector<16x32xf32>
    %c0_5 = arith.constant 0 : index
    %c0_6 = arith.constant 0 : index
    %19 = vector.load %arg3[%c0_5, %c0_6] : memref<1x32xf32, #tpu.memory_space<vmem>>, vector<1x32xf32>
    %20 = vector.broadcast %19 : vector<1x32xf32> to vector<16x32xf32>
    %21 = arith.mulf %18, %20 : vector<16x32xf32>
    %c0_7 = arith.constant 0 : index
    %c0_8 = arith.constant 0 : index
    %22 = vector.load %arg4[%c0_7, %c0_8] : memref<1x32xf32, #tpu.memory_space<vmem>>, vector<1x32xf32>
    %23 = vector.broadcast %22 : vector<1x32xf32> to vector<16x32xf32>
    %24 = arith.addf %21, %23 : vector<16x32xf32>
    %25 = arith.truncf %24 : vector<16x32xf32> to vector<16x32xbf16>
    %c0_9 = arith.constant 0 : index
    %c0_10 = arith.constant 0 : index
    %26 = vector.load %arg5[%c0_9, %c0_10] : memref<32x1xbf16, #tpu.memory_space<vmem>>, vector<32x1xbf16>
    %cst_11 = arith.constant dense<0.000000e+00> : vector<16x1xf32>
    %27 = tpu.matmul %25, %26, %cst_11 {dimension_numbers = #tpu.dot_dimension_numbers<[1], [0], [0], [1], [0, 0, 1, 1], [], []>} : vector<16x32xbf16>, vector<32x1xbf16>, vector<16x1xf32> -> vector<16x1xf32>
    %c0_12 = arith.constant 0 : index
    %c0_13 = arith.constant 0 : index
    %28 = vector.load %arg6[%c0_12, %c0_13] : memref<1x1xf32, #tpu.memory_space<vmem>>, vector<1x1xf32>
    %29 = vector.broadcast %28 : vector<1x1xf32> to vector<16x1xf32>
    %30 = arith.addf %27, %29 : vector<16x1xf32>
    %31 = math.tanh %30 : vector<16x1xf32>
    %c0_14 = arith.constant 0 : index
    %c0_15 = arith.constant 0 : index
    %32 = vector.load %arg7[%c0_14, %c0_15] : memref<16x1xf32, #tpu.memory_space<vmem>>, vector<16x1xf32>
    tpu.vector_store %arg7[%c0_14, %c0_15], %31 {strides = array<i32>} : memref<16x1xf32, #tpu.memory_space<vmem>>, vector<16x1xf32>,
    return
  }
  func.func @transform_0(%arg0: i32, %arg1: i32) -> (i32, i32) {
    %c0_i32 = arith.constant 0 : i32
    %c0_i32_0 = arith.constant 0 : i32
    return %arg0, %c0_i32 : i32, i32
  }
  func.func @transform_1(%arg0: i32, %arg1: i32) -> (i32, i32) {
    %c0_i32 = arith.constant 0 : i32
    %c0_i32_0 = arith.constant 0 : i32
    %c0_i32_1 = arith.constant 0 : i32
    return %c0_i32, %c0_i32_0 : i32, i32
  }
  func.func @transform_2(%arg0: i32, %arg1: i32) -> (i32, i32) {
    %c0_i32 = arith.constant 0 : i32
    %c0_i32_0 = arith.constant 0 : i32
    %c0_i32_1 = arith.constant 0 : i32
    return %c0_i32, %c0_i32_0 : i32, i32
  }
  func.func @transform_3(%arg0: i32, %arg1: i32) -> (i32, i32) {
    %c0_i32 = arith.constant 0 : i32
    %c0_i32_0 = arith.constant 0 : i32
    return %c0_i32, %arg1 : i32, i32
  }
  func.func @transform_4(%arg0: i32, %arg1: i32) -> (i32, i32) {
    %c0_i32 = arith.constant 0 : i32
    %c0_i32_0 = arith.constant 0 : i32
    return %c0_i32, %arg1 : i32, i32
  }
  func.func @transform_5(%arg0: i32, %arg1: i32) -> (i32, i32) {
    %c0_i32 = arith.constant 0 : i32
    return %arg0, %arg1 : i32, i32
  }
}

</mosaic_0001>

<bundles_post_ra>
// kernel: base_hf_gpt_forward.16
= control target key start
LH: loop header
LB: loop body
LE: loop exit
PB: predicated region body
PF: predicated region fallthrough
CT: control target
= control target key end

     0   :  { %vm23_vm0 = vcmask 261120   ;;  %v181_v14 = vmov 0.0   ;;  %vm182_vm1 = vmmov 0   ;;  %vm145_vm2 = vcmask 257024   ;;  %s245_s0 = inlined_call_operand.vmem [shape: f32[16,32], index: 0, kind: input, shape index: {}]   ;;  %s246_s3 = inlined_call_operand.vmem [shape: bf16[32,32], index: 3, kind: input, shape index: {}]   ;;  %s247_s1 = inlined_call_operand.vmem [shape: f32[1,32], index: 1, kind: input, shape index: {}]   ;;  %s248_s2 = inlined_call_operand.vmem [shape: f32[1,32], index: 2, kind: input, shape index: {}]   ;;  %s249_s4 = inlined_call_operand.vmem [shape: f32[1,32], index: 4, kind: input, shape index: {}]   ;;  %s250_s5 = inlined_call_operand.vmem [shape: bf16[16,32], index: 5, kind: output, shape index: {}]  }
   0x1   :  { %v21_v0 = vld [vmem:[%s245_s0] sm:$0xff]  ;;  %v22_v1 = vld [vmem:[%s245_s0 + $0x8] sm:$0xff]  ;;  %165 = vmatprep.subr.bf16.mxu0 %v181_v14  ;;  %169 = vmatprep.mubr.msk.bf16.mxu0 %vm182_vm1, %v181_v14 }
   0x2   :  { %v24_v2 = vsel %vm23_vm0, %v21_v0, 0.0  ;;  %v27_v3 = vsel %vm23_vm0, %v22_v1, 0.0  ;;  %v175_v15 = vld [vmem:[%s246_s3 + $0x8] sm:$0xff]   ;;  %v176_v16 = vld [vmem:[%s246_s3] sm:$0xff]  }
   0x3   :  { %25 = vadd.xlane.f32.xlu0 %v24_v2  ;;  %166 = vmatpush3.bf16.msra.mxu0 %v175_v15  ;;  %v152_v25 = vld [vmem:[%s247_s1] ss:$0 sm:$0xff] }
   0x4   :  { %167 = vmatprep.subr.bf16.mxu0 %v181_v14  ;;  %v153_v29 = vld [vmem:[%s248_s2] ss:$0 sm:$0xff] }
   0x5   :  { %v154_v34 = vld [vmem:[%s249_s4] ss:$0 sm:$0xff] }
   0x7   :  { %28 = vadd.xlane.f32.xlu0 %v27_v3  ;;  %168 = vmatpush3.bf16.msra.mxu0 %v176_v16 }
  0x8c   :  { %v26_v4 = vpop.xlane.xlu0 %25 }
  0x8d   :  { %v31_v5 = vmul.f32 0.03125, %v26_v4 }
  0x8f   :  { %v33_v6 = vsub.f32 %v21_v0, %v31_v5 }
  0x90   :  { %v29_v7 = vpop.xlane.xlu0 %28 }
  0x91   :  { %v32_v8 = vmul.f32 0.03125, %v29_v7  ;;  %v35_v9 = vmul.f32 %v33_v6, %v33_v6 }
  0x93   :  { %v34_v10 = vsub.f32 %v22_v1, %v32_v8  ;;  %v37_v11 = vsel %vm23_vm0, %v35_v9, 0.0 }
  0x94   :  { %38 = vadd.xlane.f32.xlu1 %v37_v11 }
  0x95   :  { %v36_v12 = vmul.f32 %v34_v10, %v34_v10 }
  0x97   :  { %v40_v13 = vsel %vm23_vm0, %v36_v12, 0.0 }
  0x98   :  { %41 = vadd.xlane.f32.xlu1 %v40_v13 }
 0x11d   :  { %v39_v17 = vpop.xlane.xlu1 %38 }
 0x11e   :  { %v43_v18 = vmul.f32 0.03125, %v39_v17 }
 0x120   :  { %v45_v19 = vadd.f32 1e-05, %v43_v18 }
 0x121   :  { %v42_v20 = vpop.xlane.xlu1 %41 }
 0x122   :  { %177 = vrsqrt.f32 %v45_v19  ;;  %v44_v21 = vmul.f32 0.03125, %v42_v20 }
 0x124   :  { %v46_v22 = vadd.f32 1e-05, %v44_v21 }
 0x126   :  { %179 = vrsqrt.f32 %v46_v22 }
 0x12f   :  { %v178_v23 = vpop.eup %177 }
 0x130   :  { %v49_v24 = vmul.f32 %v178_v23, %v33_v6 }
 0x132   :  { %v58_v28 = vmul.f32 %v152_v25, %v49_v24 }
 0x133   :  { %v180_v26 = vpop.eup %179 }
 0x134   :  { %v50_v27 = vmul.f32 %v180_v26, %v34_v10  ;;  %v67_v31 = vadd.f32 %v153_v29, %v58_v28 }
 0x136   :  { %v59_v30 = vmul.f32 %v152_v25, %v50_v27 }
 0x138   :  { %v68_v32 = vadd.f32 %v153_v29, %v59_v30 }
 0x13a   :  { %v69_v33 = vpack.c.bf16 %v68_v32, %v67_v31 }
 0x13c   :  { %170 = vmatmul.mubr.msk.bf16.vlgmr.msra.gmra.mxu0 %vm23_vm0, %v69_v33 }
 0x1fc   :  { %v130_v35 = vpop.f32.mrf.mxu0 }
 0x1fd   :  { %v131_v36 = vadd.f32 %v154_v34, %v130_v35 }
 0x1fe   :  { %v171_v37 = vpop.f32.mrf.mxu0 }
 0x1ff   :  { %v160_v38 = vpack.c.bf16 %v131_v36, %v131_v36 }
 0x200   :  { %v133_v39 = vpop.f32.mrf.mxu0 }
 0x201   :  { %146 = vst.msk [vmem:[%s250_s5] sm:$0xf] %vm145_vm2, %v160_v38  ;;  %v134_v40 = vadd.f32 %v154_v34, %v133_v39 }
 0x202   :  { %v172_v41 = vpop.f32.mrf.mxu0 }
 0x203   :  { %v161_v42 = vpack.c.bf16 %v134_v40, %v134_v40 }
 0x205   :  { %147 = vst.msk [vmem:[%s250_s5 + $0x4] sm:$0xf] %vm145_vm2, %v161_v42 }

// kernel: base_hf_gpt_forward.20
= control target key start
LH: loop header
LB: loop body
LE: loop exit
PB: predicated region body
PF: predicated region fallthrough
CT: control target
= control target key end

     0   :  { %vm22_vm0 = vcmask 261120   ;;  %v144_v0 = vmov 0.0   ;;  %vm145_vm1 = vmmov 0   ;;  %s202_s1 = inlined_call_operand.vmem [shape: bf16[32,32], index: 1, kind: input, shape index: {}]   ;;  %s203_s0 = inlined_call_operand.vmem [shape: bf16[16,32], index: 0, kind: input, shape index: {}]   ;;  %s204_s3 = inlined_call_operand.vmem [shape: f32[16,32], index: 3, kind: input, shape index: {}]   ;;  %s205_s2 = inlined_call_operand.vmem [shape: f32[1,32], index: 2, kind: input, shape index: {}]   ;;  %s206_s4 = inlined_call_operand.vmem [shape: f32[16,32], index: 4, kind: output, shape index: {}]  }
   0x1   :  { %131 = vmatprep.subr.bf16.mxu0 %v144_v0  ;;  %v141_v1 = vld [vmem:[%s202_s1 + $0x8] sm:$0xff]   ;;  %135 = vmatprep.mubr.msk.bf16.mxu0 %vm145_vm1, %v144_v0  ;;  %23 = vst.msk [vmem:[#allocation2] sm:$0xff] %vm22_vm0, %v144_v0  ;;  %24 = vst.msk [vmem:[#allocation2 + $0x8] sm:$0xff] %vm22_vm0, %v144_v0  ;;  %v142_v2 = vld [vmem:[%s202_s1] sm:$0xff]  }
   0x2   :  { %132 = vmatpush3.bf16.msra.mxu0 %v141_v1  ;;  %v143_v3 = vld [vmem:[%s203_s0] sm:$0xff]   ;;  %v103_v16 = vld [vmem:[%s204_s3 + $0x8] sm:$0xff] }
   0x3   :  { %133 = vmatprep.subr.bf16.mxu0 %v144_v0  ;;  %v102_v12 = vld [vmem:[%s204_s3] sm:$0xff] }
   0x4   :  { %v127_v14 = vld [vmem:[%s205_s2] ss:$0 sm:$0xff] }
   0x6   :  { %134 = vmatpush3.bf16.msra.mxu0 %v142_v2 }
   0x8   :  { %v25_v4 = vld [vmem:[#allocation2] sm:$0xff]  ;;  %v26_v8 = vld [vmem:[#allocation2 + $0x8] sm:$0xff] }
   0x9   :  { %136 = vmatmul.mubr.msk.bf16.vlgmr.msra.gmra.mxu0 %vm22_vm0, %v143_v3 }
  0xc9   :  { %v88_v5 = vpop.f32.mrf.mxu0 }
  0xca   :  { %v95_v6 = vadd.f32 %v88_v5, %v25_v4 }
  0xcb   :  { %v137_v7 = vpop.f32.mrf.mxu0 }
  0xcc   :  { %97 = vst.msk [vmem:[#allocation2] sm:$0xff] %vm22_vm0, %v95_v6 }
  0xcd   :  { %v91_v9 = vpop.f32.mrf.mxu0 }
  0xce   :  { %v96_v10 = vadd.f32 %v91_v9, %v26_v8 }
  0xcf   :  { %v138_v11 = vpop.f32.mrf.mxu0 }
  0xd0   :  { %98 = vst.msk [vmem:[#allocation2 + $0x8] sm:$0xff] %vm22_vm0, %v96_v10 }
  0xd3   :  { %v104_v13 = vld [vmem:[#allocation2] sm:$0xff] }
  0xd4   :  { %v106_v15 = vadd.f32 %v104_v13, %v102_v12 }
  0xd6   :  { %v115_v17 = vadd.f32 %v127_v14, %v106_v15 }
  0xd7   :  { %v105_v18 = vld [vmem:[#allocation2 + $0x8] sm:$0xff] }
  0xd8   :  { %117 = vst.msk [vmem:[%s206_s4] sm:$0xff] %vm22_vm0, %v115_v17  ;;  %v107_v19 = vadd.f32 %v105_v18, %v103_v16 }
  0xda   :  { %v116_v20 = vadd.f32 %v127_v14, %v107_v19 }
  0xdc   :  { %118 = vst.msk [vmem:[%s206_s4 + $0x8] sm:$0xff] %vm22_vm0, %v116_v20 }

// kernel: base_hf_gpt_forward.21
= control target key start
LH: loop header
LB: loop body
LE: loop exit
PB: predicated region body
PF: predicated region fallthrough
CT: control target
= control target key end

     0   :  { %vm23_vm0 = vcmask 261120   ;;  %v207_v14 = vmov 0.0   ;;  %vm208_vm1 = vmmov 0   ;;  %s268_s0 = inlined_call_operand.vmem [shape: f32[16,32], index: 0, kind: input, shape index: {}]   ;;  %s269_s3 = inlined_call_operand.vmem [shape: bf16[32,128], index: 3, kind: input, shape index: {}]   ;;  %s270_s1 = inlined_call_operand.vmem [shape: f32[1,32], index: 1, kind: input, shape index: {}]   ;;  %s271_s2 = inlined_call_operand.vmem [shape: f32[1,32], index: 2, kind: input, shape index: {}]   ;;  %s272_s4 = inlined_call_operand.vmem [shape: f32[1,128], index: 4, kind: input, shape index: {}]   ;;  %s273_s5 = inlined_call_operand.vmem [shape: bf16[16,128], index: 5, kind: output, shape index: {}]  }
   0x1   :  { %v21_v0 = vld [vmem:[%s268_s0] sm:$0xff]  ;;  %v22_v1 = vld [vmem:[%s268_s0 + $0x8] sm:$0xff]  ;;  %187 = vmatprep.subr.bf16.mxu0 %v207_v14  ;;  %191 = vmatprep.mubr.msk.bf16.mxu0 %vm208_vm1, %v207_v14 }
   0x2   :  { %v24_v2 = vsel %vm23_vm0, %v21_v0, 0.0  ;;  %v27_v3 = vsel %vm23_vm0, %v22_v1, 0.0  ;;  %v197_v15 = vld [vmem:[%s269_s3 + $0x8] sm:$0xff]   ;;  %v198_v16 = vld [vmem:[%s269_s3] sm:$0xff]  }
   0x3   :  { %25 = vadd.xlane.f32.xlu0 %v24_v2  ;;  %188 = vmatpush3.bf16.msra.mxu0 %v197_v15  ;;  %v169_v25 = vld [vmem:[%s270_s1] ss:$0 sm:$0xff] }
   0x4   :  { %189 = vmatprep.subr.bf16.mxu0 %v207_v14  ;;  %v170_v29 = vld [vmem:[%s271_s2] ss:$0 sm:$0xff] }
   0x5   :  { %v171_v34 = vld [vmem:[%s272_s4] ss:$0 sm:$0xff] }
   0x7   :  { %28 = vadd.xlane.f32.xlu0 %v27_v3  ;;  %190 = vmatpush3.bf16.msra.mxu0 %v198_v16 }
  0x8c   :  { %v26_v4 = vpop.xlane.xlu0 %25 }
  0x8d   :  { %v31_v5 = vmul.f32 0.03125, %v26_v4 }
  0x8f   :  { %v33_v6 = vsub.f32 %v21_v0, %v31_v5 }
  0x90   :  { %v29_v7 = vpop.xlane.xlu0 %28 }
  0x91   :  { %v32_v8 = vmul.f32 0.03125, %v29_v7  ;;  %v35_v9 = vmul.f32 %v33_v6, %v33_v6 }
  0x93   :  { %v34_v10 = vsub.f32 %v22_v1, %v32_v8  ;;  %v37_v11 = vsel %vm23_vm0, %v35_v9, 0.0 }
  0x94   :  { %38 = vadd.xlane.f32.xlu1 %v37_v11 }
  0x95   :  { %v36_v12 = vmul.f32 %v34_v10, %v34_v10 }
  0x97   :  { %v40_v13 = vsel %vm23_vm0, %v36_v12, 0.0 }
  0x98   :  { %41 = vadd.xlane.f32.xlu1 %v40_v13 }
 0x11d   :  { %v39_v17 = vpop.xlane.xlu1 %38 }
 0x11e   :  { %v43_v18 = vmul.f32 0.03125, %v39_v17 }
 0x120   :  { %v45_v19 = vadd.f32 1e-05, %v43_v18 }
 0x121   :  { %v42_v20 = vpop.xlane.xlu1 %41 }
 0x122   :  { %199 = vrsqrt.f32 %v45_v19  ;;  %v44_v21 = vmul.f32 0.03125, %v42_v20 }
 0x124   :  { %v46_v22 = vadd.f32 1e-05, %v44_v21 }
 0x126   :  { %201 = vrsqrt.f32 %v46_v22 }
 0x12f   :  { %v200_v23 = vpop.eup %199 }
 0x130   :  { %v49_v24 = vmul.f32 %v200_v23, %v33_v6 }
 0x132   :  { %v58_v28 = vmul.f32 %v169_v25, %v49_v24 }
 0x133   :  { %v202_v26 = vpop.eup %201 }
 0x134   :  { %v50_v27 = vmul.f32 %v202_v26, %v34_v10  ;;  %v67_v31 = vadd.f32 %v170_v29, %v58_v28 }
 0x136   :  { %v59_v30 = vmul.f32 %v169_v25, %v50_v27 }
 0x138   :  { %v68_v32 = vadd.f32 %v170_v29, %v59_v30 }
 0x13a   :  { %v69_v33 = vpack.c.bf16 %v68_v32, %v67_v31 }
 0x13c   :  { %192 = vmatmul.mubr.msk.bf16.vlgmr.msra.gmra.mxu0 %vm23_vm0, %v69_v33 }
 0x1fc   :  { %v130_v35 = vpop.f32.mrf.mxu0 }
 0x1fd   :  { %v131_v36 = vadd.f32 %v171_v34, %v130_v35 }
 0x1fe   :  { %v193_v37 = vpop.f32.mrf.mxu0 }
 0x1ff   :  { %v139_v38 = vmul.f32 0.044715, %v131_v36  ;;  %v137_v54 = vmul.f32 0.5, %v131_v36 }
 0x200   :  { %v133_v39 = vpop.f32.mrf.mxu0 }
 0x201   :  { %v141_v40 = vmul.f32 %v139_v38, %v131_v36  ;;  %v134_v41 = vadd.f32 %v171_v34, %v133_v39 }
 0x202   :  { %v194_v42 = vpop.f32.mrf.mxu0 }
 0x203   :  { %v143_v43 = vmul.f32 %v141_v40, %v131_v36  ;;  %v140_v44 = vmul.f32 0.044715, %v134_v41  ;;  %v138_v55 = vmul.f32 0.5, %v134_v41 }
 0x205   :  { %v145_v45 = vadd.f32 %v143_v43, %v131_v36  ;;  %v142_v46 = vmul.f32 %v140_v44, %v134_v41 }
 0x207   :  { %v147_v47 = vmul.f32 0.7978846, %v145_v45  ;;  %v144_v48 = vmul.f32 %v142_v46, %v134_v41 }
 0x209   :  { %203 = vtanh.f32 %v147_v47  ;;  %v146_v49 = vadd.f32 %v144_v48, %v134_v41 }
 0x20b   :  { %v148_v50 = vmul.f32 0.7978846, %v146_v49 }
 0x20d   :  { %205 = vtanh.f32 %v148_v50 }
 0x216   :  { %v204_v51 = vpop.eup %203 }
 0x217   :  { %v151_v52 = vadd.f32 1.0, %v204_v51 }
 0x219   :  { %v153_v57 = vmul.f32 %v151_v52, %v137_v54 }
 0x21a   :  { %v206_v53 = vpop.eup %205 }
 0x21b   :  { %v152_v56 = vadd.f32 1.0, %v206_v53 }
 0x21d   :  { %v154_v58 = vmul.f32 %v152_v56, %v138_v55 }
 0x21f   :  { %v182_v59 = vpack.c.bf16 %v154_v58, %v153_v57 }
 0x221   :  { %183 = vst [vmem:[%s273_s5] sm:$0xff] %v182_v59  }

// kernel: base_hf_gpt_forward.19
= control target key start
LH: loop header
LB: loop body
LE: loop exit
PB: predicated region body
PF: predicated region fallthrough
CT: control target
= control target key end

     0   :  { %s1257_s12 = smov 0   ;;  %s1259_s13 = smov 0   ;;  %s1453_s0 = inlined_call_operand.vmem [shape: bf16[2,8,32], index: 0, kind: input, shape index: {}]   ;;  %s1454_s1 = inlined_call_operand.vmem [shape: bf16[2,8,32], index: 1, kind: input, shape index: {}]   ;;  %s1455_s2 = inlined_call_operand.vmem [shape: bf16[2,8,32], index: 2, kind: input, shape index: {}]   ;;  %s1456_s3 = inlined_call_operand.vmem [shape: bf16[2,8,32], index: 3, kind: output, shape index: {}]  }
   0x1   :  { %s1261_s14 = smov 0  }
   0x2 LB: > { %s32_s15 = sadd.s32 1, %s1221_s13  ;;  %p1052_p0 = scmp.ge.s32.totalorder %s1225_s14, 1  ;;  %s1225_s14 = sphi %s1261_s14, %s13_s14   ;;  %s1221_s13 = sphi %s1259_s13, %s1458_s13   ;;  %s1217_s12 = sphi %s1257_s12, %s1457_s12  }
   0x3   : > { %p34_p1 = scmp.ge.s32.totalorder %s32_s15, 2  ;;  %p190_p2 = scmp.lt.s32.totalorder %s1225_s14, 3 }
   0x5   : > { %s1460_s15 = smov (%p34_p1, %s32_s15), 0  ;;  %p191_p3 = pnand %p1052_p0, %p190_p2 }
   0x6   : > { %p232_p4 = scmp.lt.s32.totalorder (!%p191_p3), %s1217_s12, 1  ;;  %s1231_s23 = smov (!%p191_p3), 120  }
   0x7   : > { %194 = sbr.rel (%p191_p3) target bundleno = 1341 (0x53d), region = 32  ;;  %s1232_s24 = smov (!%p191_p3), 112  }
   0x8   : > { %s1233_s25 = smov (!%p191_p3), 104   ;;  %s1234_s29 = smov (!%p191_p3), 8  }
   0x9   : > { %s1235_s30 = smov (!%p191_p3), 16   ;;  %s1236_s4 = smov (!%p191_p3), 24  }
   0xc   : > { %v1227_v0 = vmov 0.0   ;;  %vm1228_vm0 = vmmov 0   ;;  %s1462_s12 = smov (!%p232_p4, %s1217_s12), 1  ;;  %vm298_vm1 = vcmask 64512   ;;  %vm267_vm2 = vcmask 7168  }
   0xd   : > { %1089 = vmatprep.subr.bf16.mxu0 %v1227_v0  ;;  %1091 = vmatprep.mubr.msk.bf16.mxu0 %vm1228_vm0, %v1227_v0  ;;  %s1281_s16 = sshll.u32 %s1462_s12, 2  ;;  %v1229_v7 = vmov -1e+30   ;;  %272 = vst.msk [vmem:[#allocation3] sm:$0xff] %vm267_vm2, %v1227_v0  ;;  %273 = vst.msk [vmem:[#allocation3 + $0x8] sm:$0xff] %vm267_vm2, %v1227_v0  ;;  %v283_v8 = vlaneseq  ;;  %v1230_v17 = vmov 0  }
   0xe   : > { %1095 = vmatprep.subr.bf16.mxu1 %v1227_v0  ;;  %1097 = vmatprep.mubr.msk.bf16.mxu1 %vm1228_vm0, %v1227_v0  ;;  %s1287_s19 = scalar_lea.vmem %s1454_s1, %s1281_s16  ;;  %s1293_s22 = scalar_lea.vmem %s1453_s0, %s1281_s16  ;;  %268 = vst.msk [vmem:[#allocation2] sm:$0xff] %vm267_vm2, %v1229_v7  ;;  %269 = vst.msk [vmem:[#allocation2 + $0x8] sm:$0xff] %vm267_vm2, %v1229_v7  ;;  %vm381_vm4 = vcmask 1043456   ;;  %vm276_vm5 = vcmask 261120   ;;  %vm578_vm6 = vcmask 130112   ;;  %vm731_vm7 = vcmask 195712  }
   0xf   : > { %v296_v1 = vld [vmem:[%s1287_s19] sm:$0xf]  ;;  %270 = vst.msk [vmem:[#allocation2 + $0x10] sm:$0xff] %vm267_vm2, %v1229_v7  ;;  %271 = vst.msk [vmem:[#allocation2 + $0x18] sm:$0xff] %vm267_vm2, %v1229_v7  ;;  %v1314_v9 = vshrl.u32 %v283_v8, 7  ;;  %v1316_v10 = vand.u32 127, %v283_v8  ;;  %1171 = vset.pattern.permute.xlu0 %v1230_v17  ;;  %1172 = vset.pattern.permute.xlu1 %v1230_v17  ;;  %s1345_s28 = scalar_lea.vmem %s1455_s2, %s1281_s16  ;;  %s259_s7 = scalar_lea.vmem %s1456_s3, %s1281_s16 }
  0x10   : > { %v292_v2 = vld [vmem:[%s1293_s22] sm:$0xf]  ;;  %v303_v3 = vsel %vm298_vm1, %v296_v1, 0  ;;  %274 = vst.msk [vmem:[#allocation3 + $0x10] sm:$0xff] %vm267_vm2, %v1227_v0  ;;  %275 = vst.msk [vmem:[#allocation3 + $0x18] sm:$0xff] %vm267_vm2, %v1227_v0  ;;  %vm884_vm8 = vcmask 261312  }
  0x11   : > { %v293_v4 = vunpack.c.l.bf16 %v292_v2  ;;  %1090 = vmatpush3.bf16.xpose.msra.mxu0 %v303_v3  ;;  %vm291_vm3 = vcmp.le.s32.totalorder %v1316_v10, %v1314_v9  ;;  %v1173_v18 = vld [vmem:[%s1287_s19] ss:$0 sps:$4 sm:$0xff]   ;;  %277 = vst.msk [vmem:[#allocation4] sm:$0xff] %vm276_vm5, %v1227_v0  ;;  %vm900_vm9 = vcmask 60416   ;;  %vm913_vm10 = vcmask 126016  }
  0x12   : > { %1107 = vmatprep.subr.bf16.mxu0 %v1227_v0  ;;  %v428_v19 = vld [vmem:[%s1293_s22] sm:$0xf]  ;;  %440 = vrot.lane.b32.xlu1 %v1173_v18, %s1231_s23  ;;  %vm926_vm11 = vcmask 191616   ;;  %vm939_vm12 = vcmask 257216  }
  0x13   : > { %v294_v5 = vmul.f32 0.35355338, %v293_v4  ;;  %v429_v20 = vunpack.c.l.bf16 %v428_v19  ;;  %v581_v21 = vld [vmem:[%s1293_s22] sm:$0xf] }
  0x14   : > { %v582_v23 = vunpack.c.l.bf16 %v581_v21  ;;  %v1174_v25 = vld [vmem:[%s1287_s19] ss:$0 sps:$4 sm:$0xff]  }
  0x15   : > { %v295_v6 = vpack.c.bf16 %v294_v5, %v294_v5  ;;  %v430_v22 = vmul.f32 0.35355338, %v429_v20  ;;  %v734_v27 = vld [vmem:[%s1293_s22] sm:$0xf] }
  0x16   : > { %v583_v26 = vmul.f32 0.35355338, %v582_v23  ;;  %v735_v29 = vunpack.c.l.bf16 %v734_v27  ;;  %v1175_v30 = vld [vmem:[%s1287_s19] ss:$0 sps:$4 sm:$0xff]   ;;  %v643_v9 = vld [vmem:[#allocation2 + $0x10] sm:$0xff]  ;;  %v1396_v21 = vld [vmem:[#allocation2 + $0x18] sm:$0xff] }
  0x17   : > { %v431_v24 = vpack.c.bf16 %v430_v22, %v430_v22  ;;  %v1336_v33 = vld [vmem:[#allocation2] sm:$0xff] }
  0x18   : > { %1092 = vmatmul.mubr.msk.bf16.vlgmr.msra.gmra.mxu0 %vm298_vm1, %v295_v6  ;;  %v584_v28 = vpack.c.bf16 %v583_v26, %v583_v26  ;;  %v736_v31 = vmul.f32 0.35355338, %v735_v29  ;;  %v297_v37 = vld [vmem:[%s1345_s28] sm:$0xf] }
  0x19   : > { %1109 = vmatprep.mubr.msk.bf16.mxu0 %vm1228_vm0, %v1227_v0  ;;  %435 = vrot.lane.b32.xlu1 %v431_v24, %s1231_s23  ;;  %v383_v38 = vsel %vm381_vm4, %v297_v37, 0  ;;  %v1176_v18 = vld [vmem:[%s1345_s28] ss:$0 sps:$4 sm:$0xff]  }
  0x1a   : > { %v737_v32 = vpack.c.bf16 %v736_v31, %v736_v31  ;;  %1096 = vmatpush3.bf16.msra.mxu1 %v383_v38  ;;  %v1178_v26 = vld [vmem:[%s1345_s28] ss:$0 sps:$4 sm:$0xff]  }
  0x1b   : > { %1101 = vmatprep.subr.bf16.mxu1 %v1227_v0 }
  0x1d   : > { %593 = vrot.lane.b32.xlu1 %v1174_v25, %s1232_s24  ;;  %v1177_v25 = vld [vmem:[%s1345_s28] ss:$0 sps:$4 sm:$0xff]  }
  0x21   : > { %588 = vrot.lane.b32.xlu1 %v584_v28, %s1232_s24 }
  0x25   : > { %746 = vrot.lane.b32.xlu1 %v1175_v30, %s1233_s25 }
  0x29   : > { %741 = vrot.lane.b32.xlu1 %v737_v32, %s1233_s25 }
  0x84   : > { %v441_v42 = vpop.permute.xlu1 %440 }
  0x85   : > { %v446_v45 = vsel %vm298_vm1, %v441_v42, 0 }
  0x8b   : > { %v436_v43 = vpop.permute.xlu1 %435 }
  0x8f   : > { %v594_v47 = vpop.permute.xlu1 %593 }
  0x90   : > { %v599_v49 = vsel %vm298_vm1, %v594_v47, 0 }
  0x93   : > { %v589_v48 = vpop.permute.xlu1 %588 }
  0x97   : > { %v747_v50 = vpop.permute.xlu1 %746 }
  0x98   : > { %v752_v51 = vsel %vm298_vm1, %v747_v50, 0 }
  0x9b   : > { %v742_v52 = vpop.permute.xlu1 %741 }
  0xd8   : > { %v339_v11 = vpop.f32.mrf.mxu0 }
  0xd9   : > { %v345_v12 = vsel %vm291_vm3, %v339_v11, -1e+30 }
  0xda   : > { %v1093_v13 = vpop.f32.mrf.mxu0  ;;  %v348_v14 = vsel %vm298_vm1, %v345_v12, -inf }
  0xdb   : > { %349 = vmax.xlane.f32.xlu0 %v348_v14 }
  0xdc   : > { %v342_v15 = vpop.f32.mrf.mxu0 }
  0xdd   : > { %v490_v15 = vld [vmem:[#allocation2 + $0x8] sm:$0xff] }
  0xde   : > { %v1094_v16 = vpop.f32.mrf.mxu0 }
 0x164   : > { %v350_v34 = vpop.xlane.xlu0 %349 }
 0x165   : > { %v351_v35 = vmax.f32 %v1336_v33, %v350_v34 }
 0x167   : > { %v352_v36 = vsub.f32 %v1336_v33, %v351_v35  ;;  %427 = vst.msk [vmem:[#allocation2] sm:$0xff] %vm267_vm2, %v351_v35  ;;  %357 = vperm.xlu0 %1171, %v351_v35  }
 0x169   : > { %v353_v14 = vmul.f32 1.442695, %v352_v36 }
 0x1e2   : > { %v358_v39 = vpop.permute.xlu0 %357 }
 0x1e3   : > { %v360_v40 = vsub.f32 %v345_v12, %v358_v39 }
 0x1e5   : > { %v361_v41 = vmul.f32 1.442695, %v360_v40 }
 0x1e7   : > { %1179 = vpow2.f32 %v361_v41  ;;  %v370_v41 = vld [vmem:[#allocation4] sm:$0xff] }
 0x1e8   : > { %1181 = vpow2.f32 %v353_v14  ;;  %v798_v14 = vld [vmem:[#allocation3 + $0x18] sm:$0xff] }
 0x1f4   : > { %v1350_v44 = vpop.eup %1179 }
 0x1f5   : > { %v377_v46 = vpack.c.bf16 %v1350_v44, %v1350_v44  ;;  %v1394_v20 = vpop.eup %1181  ;;  %v364_v30 = vsel %vm298_vm1, %v1350_v44, 0.0 }
 0x1f7   : > { %1098 = vmatmul.mubr.msk.bf16.vlgmr.msra.gmra.mxu1 %vm298_vm1, %v377_v46 }
 0x1f8   : > { %1102 = vmatpush3.bf16.xpose.msra.mxu1 %v446_v45  ;;  %1103 = vmatprep.mubr.msk.bf16.mxu1 %vm1228_vm0, %v1227_v0 }
 0x1f9   : > { %1113 = vmatprep.subr.bf16.mxu1 %v1227_v0 }
 0x1ff   : > { %1104 = vmatmul.mubr.msk.bf16.vlgmr.msra.gmra.mxu1 %vm298_vm1, %v436_v43 }
 0x200   : > { %1114 = vmatpush3.bf16.xpose.msra.mxu1 %v599_v49  ;;  %1115 = vmatprep.mubr.msk.bf16.mxu1 %vm1228_vm0, %v1227_v0 }
 0x201   : > { %1125 = vmatprep.subr.bf16.mxu1 %v1227_v0 }
 0x207   : > { %1116 = vmatmul.mubr.msk.bf16.vlgmr.msra.gmra.mxu1 %vm298_vm1, %v589_v48 }
 0x208   : > { %1126 = vmatpush3.bf16.xpose.msra.mxu1 %v752_v51  ;;  %1127 = vmatprep.mubr.msk.bf16.mxu1 %vm1228_vm0, %v1227_v0 }
 0x20f   : > { %1128 = vmatmul.mubr.msk.bf16.vlgmr.msra.gmra.mxu1 %vm298_vm1, %v742_v52 }
 0x2b7   : > { %v1369_v53 = vpop.f32.mrf.mxu1 }
 0x2b9   : > { %v1099_v54 = vpop.f32.mrf.mxu1 }
 0x2bb   : > { %v422_v55 = vpop.f32.mrf.mxu1 }
 0x2bd   : > { %v1100_v56 = vpop.f32.mrf.mxu1 }
 0x2bf   : > { %v482_v57 = vpop.f32.mrf.mxu1 }
 0x2c0   : > { %v488_v58 = vsel %vm291_vm3, %v482_v57, -1e+30 }
 0x2c1   : > { %v1105_v59 = vpop.f32.mrf.mxu1  ;;  %v493_v60 = vsel %vm298_vm1, %v488_v58, -inf }
 0x2c2   : > { %494 = vmax.xlane.f32.xlu1 %v493_v60 }
 0x2c3   : > { %v485_v61 = vpop.f32.mrf.mxu1 }
 0x2c5   : > { %v1106_v62 = vpop.f32.mrf.mxu1 }
 0x2c6   : > { %v347_v62 = vld [vmem:[#allocation3] sm:$0xff] }
 0x2c7   : > { %v635_v63 = vpop.f32.mrf.mxu1 }
 0x2c8   : > { %v1378_v1 = vsel %vm291_vm3, %v635_v63, -1e+30  ;;  %v363_v63 = vmul.f32 %v1394_v20, %v347_v62 }
 0x2c9   : > { %v1117_v2 = vpop.f32.mrf.mxu1  ;;  %v646_v3 = vsel %vm298_vm1, %v1378_v1, -inf }
 0x2ca   : > { %647 = vmax.xlane.f32.xlu0 %v646_v3 }
 0x2cb   : > { %v638_v4 = vpop.f32.mrf.mxu1 }
 0x2cc   : > { %v492_v4 = vld [vmem:[#allocation3 + $0x8] sm:$0xff] }
 0x2cd   : > { %v1118_v5 = vpop.f32.mrf.mxu1 }
 0x2cf   : > { %v788_v6 = vpop.f32.mrf.mxu1 }
 0x2d0   : > { %v1385_v7 = vsel %vm291_vm3, %v788_v6, -1e+30 }
 0x2d1   : > { %v1129_v8 = vpop.f32.mrf.mxu1  ;;  %v799_v11 = vsel %vm298_vm1, %v1385_v7, -inf }
 0x2d2   : > { %800 = vmax.xlane.f32.xlu1 %v799_v11 }
 0x2d3   : > { %v791_v12 = vpop.f32.mrf.mxu1 }
 0x2d5   : > { %v1130_v13 = vpop.f32.mrf.mxu1 }
 0x34b   : > { %v495_v16 = vpop.xlane.xlu1 %494 }
 0x34c   : > { %v496_v17 = vmax.f32 %v490_v15, %v495_v16 }
 0x34e   : > { %580 = vst.msk [vmem:[#allocation2 + $0x8] sm:$0xff] %vm267_vm2, %v496_v17  ;;  %502 = vperm.xlu1 %1172, %v496_v17   ;;  %v497_v27 = vsub.f32 %v490_v15, %v496_v17 }
 0x350   : > { %v498_v28 = vmul.f32 1.442695, %v497_v27 }
 0x352   : > { %525 = vrot.lane.b32.xlu1 %v1176_v18, %s1231_s23  ;;  %1183 = vpow2.f32 %v498_v28 }
 0x353   : > { %v648_v10 = vpop.xlane.xlu0 %647 }
 0x354   : > { %v649_v19 = vmax.f32 %v643_v9, %v648_v10 }
 0x356   : > { %733 = vst.msk [vmem:[#allocation2 + $0x10] sm:$0xff] %vm267_vm2, %v649_v19  ;;  %655 = vperm.xlu0 %1171, %v649_v19   ;;  %v650_v29 = vsub.f32 %v643_v9, %v649_v19 }
 0x358   : > { %v651_v31 = vmul.f32 1.442695, %v650_v29 }
 0x35a   : > { %373 = vperm.xlu0 %1171, %v1394_v20   ;;  %1185 = vpow2.f32 %v651_v31 }
 0x35b   : > { %v801_v22 = vpop.xlane.xlu1 %800 }
 0x35c   : > { %v1400_v23 = vmax.f32 %v1396_v21, %v801_v22 }
 0x35e   : > { %v803_v24 = vsub.f32 %v1396_v21, %v1400_v23  ;;  %886 = vst.msk [vmem:[#allocation2 + $0x18] sm:$0xff] %vm267_vm2, %v1400_v23  ;;  %808 = vperm.xlu1 %1172, %v1400_v23  }
 0x35f   : > { %v1184_v32 = vpop.eup %1183 }
 0x360   : > { %v804_v3 = vmul.f32 1.442695, %v803_v24 }
 0x362   : > { %678 = vrot.lane.b32.xlu1 %v1177_v25, %s1232_s24 }
 0x366   : > { %831 = vrot.lane.b32.xlu1 %v1178_v26, %s1233_s25 }
 0x367   : > { %v1186_v33 = vpop.eup %1185 }
 0x38a   : > { %365 = vadd.xlane.f32.xlu1 %v364_v30 }
 0x39b   : > { %517 = vperm.xlu1 %1172, %v1184_v32  }
 0x39f   : > { %670 = vperm.xlu1 %1172, %v1186_v33  }
 0x3c9   : > { %v503_v34 = vpop.permute.xlu1 %502 }
 0x3ca   : > { %v505_v35 = vsub.f32 %v488_v58, %v503_v34 }
 0x3cc   : > { %v506_v36 = vmul.f32 1.442695, %v505_v35 }
 0x3cd   : > { %v526_v37 = vpop.permute.xlu1 %525 }
 0x3ce   : > { %1187 = vpow2.f32 %v506_v36  ;;  %v531_v38 = vsel %vm381_vm4, %v526_v37, 0 }
 0x3cf   : > { %1108 = vmatpush3.bf16.msra.mxu0 %v531_v38 }
 0x3d0   : > { %1119 = vmatprep.subr.bf16.mxu0 %v1227_v0 }
 0x3d1   : > { %v656_v39 = vpop.permute.xlu0 %655 }
 0x3d2   : > { %v658_v40 = vsub.f32 %v1378_v1, %v656_v39 }
 0x3d4   : > { %v659_v42 = vmul.f32 1.442695, %v658_v40 }
 0x3d5   : > { %v374_v43 = vpop.permute.xlu0 %373 }
 0x3d6   : > { %1189 = vpow2.f32 %v659_v42  ;;  %v376_v44 = vmul.f32 %v374_v43, %v370_v41 }
 0x3d8   : > { %v425_v45 = vadd.f32 %v1369_v53, %v376_v44 }
 0x3d9   : > { %v809_v46 = vpop.permute.xlu1 %808 }
 0x3da   : > { %426 = vst.msk [vmem:[#allocation4] sm:$0xff] %vm298_vm1, %v425_v45  ;;  %v811_v47 = vsub.f32 %v1385_v7, %v809_v46  ;;  %v645_v7 = vld [vmem:[#allocation3 + $0x10] sm:$0xff] }
 0x3db   : > { %v1188_v48 = vpop.eup %1187  ;;  %v661_v8 = vmul.f32 %v1186_v33, %v645_v7 }
 0x3dc   : > { %v812_v49 = vmul.f32 1.442695, %v811_v47  ;;  %v509_v50 = vsel %vm298_vm1, %v1188_v48, 0.0  ;;  %v521_v51 = vpack.c.bf16 %v1188_v48, %v1188_v48 }
 0x3dd   : > { %v679_v52 = vpop.permute.xlu1 %678  ;;  %510 = vadd.xlane.f32.xlu0 %v509_v50 }
 0x3de   : > { %1191 = vpow2.f32 %v812_v49  ;;  %v684_v54 = vsel %vm381_vm4, %v679_v52, 0  ;;  %1110 = vmatmul.mubr.msk.bf16.vlgmr.msra.gmra.mxu0 %vm298_vm1, %v521_v51 }
 0x3df   : > { %1120 = vmatpush3.bf16.msra.mxu0 %v684_v54  ;;  %1121 = vmatprep.mubr.msk.bf16.mxu0 %vm1228_vm0, %v1227_v0  ;;  %1193 = vpow2.f32 %v804_v3 }
 0x3e0   : > { %1131 = vmatprep.subr.bf16.mxu0 %v1227_v0 }
 0x3e1   : > { %v832_v53 = vpop.permute.xlu1 %831  ;;  %v514_v37 = vld [vmem:[#allocation4] sm:$0xff] }
 0x3e2   : > { %v837_v58 = vsel %vm381_vm4, %v832_v53, 0 }
 0x3e3   : > { %v1190_v55 = vpop.eup %1189 }
 0x3e4   : > { %v662_v56 = vsel %vm298_vm1, %v1190_v55, 0.0  ;;  %v674_v57 = vpack.c.bf16 %v1190_v55, %v1190_v55 }
 0x3e5   : > { %663 = vadd.xlane.f32.xlu0 %v662_v56 }
 0x3e6   : > { %1122 = vmatmul.mubr.msk.bf16.vlgmr.msra.gmra.mxu0 %vm298_vm1, %v674_v57 }
 0x3e7   : > { %1132 = vmatpush3.bf16.msra.mxu0 %v837_v58  ;;  %1133 = vmatprep.mubr.msk.bf16.mxu0 %vm1228_vm0, %v1227_v0  ;;  %v508_v0 = vmul.f32 %v1184_v32, %v492_v4 }
 0x3eb   : > { %v1192_v59 = vpop.eup %1191 }
 0x3ec   : > { %v815_v60 = vsel %vm298_vm1, %v1192_v59, 0.0  ;;  %v827_v61 = vpack.c.bf16 %v1192_v59, %v1192_v59  ;;  %v1194_v13 = vpop.eup %1193 }
 0x3ed   : > { %816 = vadd.xlane.f32.xlu0 %v815_v60  ;;  %v814_v15 = vmul.f32 %v1194_v13, %v798_v14 }
 0x3ee   : > { %1134 = vmatmul.mubr.msk.bf16.vlgmr.msra.gmra.mxu0 %vm298_vm1, %v827_v61 }
 0x413   : > { %v366_v1 = vpop.xlane.xlu1 %365 }
 0x414   : > { %v367_v2 = vadd.f32 %v366_v1, %v363_v63 }
 0x416   : > { %369 = vst.msk [vmem:[#allocation3] sm:$0xff] %vm267_vm2, %v367_v2 }
 0x417   : > { %v518_v36 = vpop.permute.xlu1 %517 }
 0x418   : > { %v520_v38 = vmul.f32 %v518_v36, %v514_v37 }
 0x41b   : > { %v671_v41 = vpop.permute.xlu1 %670 }
 0x41d   : > { %v890_v18 = vld [vmem:[#allocation3] sm:$0xff] }
 0x41e   : > { %1195 = vrcp.f32 %v890_v18 }
 0x42b   : > { %v1196_v20 = vpop.eup %1195 }
 0x466   : > { %v511_v5 = vpop.xlane.xlu0 %510 }
 0x467   : > { %v512_v6 = vadd.f32 %v511_v5, %v508_v0 }
 0x469   : > { %513 = vst.msk [vmem:[#allocation3 + $0x8] sm:$0xff] %vm267_vm2, %v512_v6 }
 0x46e   : > { %v664_v11 = vpop.xlane.xlu0 %663 }
 0x46f   : > { %v665_v12 = vadd.f32 %v664_v11, %v661_v8 }
 0x470   : > { %v903_v22 = vld [vmem:[#allocation3 + $0x8] sm:$0xff] }
 0x471   : > { %666 = vst.msk [vmem:[#allocation3 + $0x10] sm:$0xff] %vm267_vm2, %v665_v12 }
 0x476   : > { %v817_v16 = vpop.xlane.xlu0 %816 }
 0x477   : > { %v818_v17 = vadd.f32 %v817_v16, %v814_v15 }
 0x478   : > { %v916_v9 = vld [vmem:[#allocation3 + $0x10] sm:$0xff] }
 0x479   : > { %819 = vst.msk [vmem:[#allocation3 + $0x18] sm:$0xff] %vm267_vm2, %v818_v17  ;;  %1197 = vrcp.f32 %v916_v9 }
 0x47a   : > { %1199 = vrcp.f32 %v903_v22 }
 0x480   : > { %v929_v26 = vld [vmem:[#allocation3 + $0x18] sm:$0xff] }
 0x481   : > { %1201 = vrcp.f32 %v929_v26 }
 0x486   : > { %v1198_v24 = vpop.eup %1197 }
 0x487   : > { %v1200_v32 = vpop.eup %1199 }
 0x48e   : > { %v1202_v35 = vpop.eup %1201 }
 0x49e   : > { %v567_v10 = vpop.f32.mrf.mxu0 }
 0x49f   : > { %574 = vrot.lane.b32.xlu0 %v567_v10, %s1234_s29 }
 0x4a0   : > { %v1111_v19 = vpop.f32.mrf.mxu0 }
 0x4a2   : > { %v570_v21 = vpop.f32.mrf.mxu0 }
 0x4a3   : > { %895 = vperm.xlu0 %1171, %v1196_v20  }
 0x4a4   : > { %v1112_v23 = vpop.f32.mrf.mxu0 }
 0x4a6   : > { %v720_v25 = vpop.f32.mrf.mxu0 }
 0x4a7   : > { %921 = vperm.xlu0 %1171, %v1198_v24   ;;  %727 = vrot.lane.b32.xlu1 %v720_v25, %s1235_s30 }
 0x4a8   : > { %v1123_v27 = vpop.f32.mrf.mxu0 }
 0x4aa   : > { %v723_v28 = vpop.f32.mrf.mxu0 }
 0x4ab   : > { %823 = vperm.xlu1 %1172, %v1194_v13  }
 0x4ac   : > { %v1124_v29 = vpop.f32.mrf.mxu0 }
 0x4ae   : > { %v873_v30 = vpop.f32.mrf.mxu0 }
 0x4af   : > { %880 = vrot.lane.b32.xlu1 %v873_v30, %s1236_s4 }
 0x4b0   : > { %v1135_v31 = vpop.f32.mrf.mxu0 }
 0x4b2   : > { %v876_v33 = vpop.f32.mrf.mxu0 }
 0x4b3   : > { %908 = vperm.xlu1 %1172, %v1200_v32  }
 0x4b4   : > { %v1136_v34 = vpop.f32.mrf.mxu0 }
 0x4b7   : > { %934 = vperm.xlu1 %1172, %v1202_v35  }
 0x511   : > { %v575_v39 = vpop.permute.xlu0 %574 }
 0x512   : > { %v577_v40 = vadd.f32 %v575_v39, %v520_v38 }
 0x514   : > { %579 = vst.msk [vmem:[#allocation4] sm:$0xff] %vm578_vm6, %v577_v40 }
 0x519   : > { %v728_v44 = vpop.permute.xlu1 %727 }
 0x51b   : > { %v667_v42 = vld [vmem:[#allocation4] sm:$0xff] }
 0x51c   : > { %v673_v43 = vmul.f32 %v671_v41, %v667_v42 }
 0x51e   : > { %v730_v45 = vadd.f32 %v728_v44, %v673_v43  ;;  %v896_v51 = vpop.permute.xlu0 %895 }
 0x520   : > { %732 = vst.msk [vmem:[#allocation4] sm:$0xff] %vm731_vm7, %v730_v45 }
 0x522   : > { %v922_v54 = vpop.permute.xlu0 %921 }
 0x526   : > { %v824_v46 = vpop.permute.xlu1 %823 }
 0x527   : > { %v820_v47 = vld [vmem:[#allocation4] sm:$0xff] }
 0x528   : > { %v826_v48 = vmul.f32 %v824_v46, %v820_v47 }
 0x52a   : > { %v881_v49 = vpop.permute.xlu1 %880 }
 0x52b   : > { %v883_v50 = vadd.f32 %v881_v49, %v826_v48 }
 0x52d   : > { %885 = vst.msk [vmem:[#allocation4] sm:$0xff] %vm884_vm8, %v883_v50 }
 0x52e   : > { %v909_v52 = vpop.permute.xlu1 %908 }
 0x532   : > { %v935_v58 = vpop.permute.xlu1 %934 }
 0x534   : > { %v892_v53 = vld [vmem:[#allocation4] sm:$0xff] }
 0x535   : > { %v898_v55 = vmul.f32 %v896_v51, %v892_v53  ;;  %v911_v56 = vmul.f32 %v909_v52, %v892_v53  ;;  %v924_v57 = vmul.f32 %v922_v54, %v892_v53  ;;  %v937_v59 = vmul.f32 %v935_v58, %v892_v53 }
 0x537   : > { %v899_v60 = vpack.c.bf16 %v898_v55, %v898_v55  ;;  %v912_v61 = vpack.c.bf16 %v911_v56, %v911_v56  ;;  %v925_v62 = vpack.c.bf16 %v924_v57, %v924_v57  ;;  %v938_v63 = vpack.c.bf16 %v937_v59, %v937_v59 }
 0x539   : > { %901 = vst.msk [vmem:[%s259_s7] sm:$0xf] %vm900_vm9, %v899_v60 }
 0x53a   : > { %914 = vst.msk [vmem:[%s259_s7] sm:$0xf] %vm913_vm10, %v912_v61 }
 0x53b   : > { %927 = vst.msk [vmem:[%s259_s7] sm:$0xf] %vm926_vm11, %v925_v62 }
 0x53c   : > { %940 = vst.msk [vmem:[%s259_s7] sm:$0xf] %vm939_vm12, %v938_v63 }
 0x53d PF: > { %s13_s14 = sadd.s32 1, %s1225_s14   ;;  %s1457_s12 = smov %s1221_s13 }
 0x53e   : > { %p10_p5 = scmp.ge.s32.totalorder %s13_s14, 4   ;;  %s1458_s13 = smov %s1460_s15 }
 0x540   :  { %12 = sbr.rel (!%p10_p5) target bundleno = 2 (0x2), region = 89 }

// kernel: base_hf_gpt_forward.22
= control target key start
LH: loop header
LB: loop body
LE: loop exit
PB: predicated region body
PF: predicated region fallthrough
CT: control target
= control target key end

     0   :  { %vm22_vm0 = vcmask 261120   ;;  %v219_v0 = vmov 0.0   ;;  %vm220_vm1 = vmmov 0   ;;  %s294_s1 = inlined_call_operand.vmem [shape: bf16[128,32], index: 1, kind: input, shape index: {}]   ;;  %s295_s0 = inlined_call_operand.vmem [shape: bf16[16,128], index: 0, kind: input, shape index: {}]   ;;  %s296_s3 = inlined_call_operand.vmem [shape: f32[16,32], index: 3, kind: input, shape index: {}]   ;;  %s297_s2 = inlined_call_operand.vmem [shape: f32[1,32], index: 2, kind: input, shape index: {}]   ;;  %s298_s4 = inlined_call_operand.vmem [shape: f32[16,32], index: 4, kind: output, shape index: {}]  }
   0x1   :  { %188 = vmatprep.subr.bf16.mxu0 %v219_v0  ;;  %v210_v1 = vld [vmem:[%s294_s1 + $0x38] sm:$0xff]   ;;  %204 = vmatprep.mubr.msk.bf16.mxu0 %vm220_vm1, %v219_v0  ;;  %23 = vst.msk [vmem:[#allocation2] sm:$0xff] %vm22_vm0, %v219_v0  ;;  %24 = vst.msk [vmem:[#allocation2 + $0x8] sm:$0xff] %vm22_vm0, %v219_v0  ;;  %v211_v2 = vld [vmem:[%s294_s1 + $0x30] sm:$0xff]  }
   0x2   :  { %189 = vmatpush3.bf16.msra.mxu0 %v210_v1  ;;  %v212_v3 = vld [vmem:[%s294_s1 + $0x28] sm:$0xff]   ;;  %v213_v4 = vld [vmem:[%s294_s1 + $0x20] sm:$0xff]   ;;  %v214_v5 = vld [vmem:[%s294_s1 + $0x18] sm:$0xff]  }
   0x3   :  { %190 = vmatprep.subr.bf16.mxu0 %v219_v0  ;;  %v215_v6 = vld [vmem:[%s294_s1 + $0x10] sm:$0xff]   ;;  %v216_v7 = vld [vmem:[%s294_s1 + $0x8] sm:$0xff]   ;;  %v217_v8 = vld [vmem:[%s294_s1] sm:$0xff]  }
   0x4   :  { %v218_v9 = vld [vmem:[%s295_s0] sm:$0xff]   ;;  %v149_v22 = vld [vmem:[%s296_s3 + $0x8] sm:$0xff] }
   0x5   :  { %v148_v18 = vld [vmem:[%s296_s3] sm:$0xff] }
   0x6   :  { %191 = vmatpush3.bf16.msra.mxu0 %v211_v2  ;;  %v178_v20 = vld [vmem:[%s297_s2] ss:$0 sm:$0xff] }
   0x7   :  { %192 = vmatprep.subr.bf16.mxu0 %v219_v0 }
   0x8   :  { %v25_v10 = vld [vmem:[#allocation2] sm:$0xff]  ;;  %v26_v14 = vld [vmem:[#allocation2 + $0x8] sm:$0xff] }
   0xa   :  { %193 = vmatpush3.bf16.msra.mxu0 %v212_v3 }
   0xb   :  { %194 = vmatprep.subr.bf16.mxu0 %v219_v0 }
   0xe   :  { %195 = vmatpush3.bf16.msra.mxu0 %v213_v4 }
   0xf   :  { %196 = vmatprep.subr.bf16.mxu0 %v219_v0 }
  0x12   :  { %197 = vmatpush3.bf16.msra.mxu0 %v214_v5 }
  0x13   :  { %198 = vmatprep.subr.bf16.mxu0 %v219_v0 }
  0x16   :  { %199 = vmatpush3.bf16.msra.mxu0 %v215_v6 }
  0x17   :  { %200 = vmatprep.subr.bf16.mxu0 %v219_v0 }
  0x1a   :  { %201 = vmatpush3.bf16.msra.mxu0 %v216_v7 }
  0x1b   :  { %202 = vmatprep.subr.bf16.mxu0 %v219_v0 }
  0x1e   :  { %203 = vmatpush3.bf16.msra.mxu0 %v217_v8 }
  0x21   :  { %205 = vmatmul.mubr.bf16.vlgmr.msra.gmra.mxu0 %v218_v9 }
  0xe1   :  { %v133_v11 = vpop.f32.mrf.mxu0 }
  0xe2   :  { %v140_v12 = vadd.f32 %v133_v11, %v25_v10 }
  0xe3   :  { %v206_v13 = vpop.f32.mrf.mxu0 }
  0xe4   :  { %143 = vst.msk [vmem:[#allocation2] sm:$0xff] %vm22_vm0, %v140_v12 }
  0xe5   :  { %v136_v15 = vpop.f32.mrf.mxu0 }
  0xe6   :  { %v141_v16 = vadd.f32 %v136_v15, %v26_v14 }
  0xe7   :  { %v207_v17 = vpop.f32.mrf.mxu0 }
  0xe8   :  { %144 = vst.msk [vmem:[#allocation2 + $0x8] sm:$0xff] %vm22_vm0, %v141_v16 }
  0xeb   :  { %v150_v19 = vld [vmem:[#allocation2] sm:$0xff] }
  0xec   :  { %v152_v21 = vadd.f32 %v150_v19, %v148_v18 }
  0xee   :  { %v161_v23 = vadd.f32 %v178_v20, %v152_v21 }
  0xef   :  { %v151_v24 = vld [vmem:[#allocation2 + $0x8] sm:$0xff] }
  0xf0   :  { %163 = vst.msk [vmem:[%s298_s4] sm:$0xff] %vm22_vm0, %v161_v23  ;;  %v153_v25 = vadd.f32 %v151_v24, %v149_v22 }
  0xf2   :  { %v162_v26 = vadd.f32 %v178_v20, %v153_v25 }
  0xf4   :  { %164 = vst.msk [vmem:[%s298_s4 + $0x8] sm:$0xff] %vm22_vm0, %v162_v26 }

// kernel: base_hf_gpt_forward.30
= control target key start
LH: loop header
LB: loop body
LE: loop exit
PB: predicated region body
PF: predicated region fallthrough
CT: control target
= control target key end

     0   :  { %vm21_vm0 = vcmask 261120   ;;  %s252_s0 = inlined_call_operand.vmem [shape: f32[16,32], index: 0, kind: input, shape index: {}]   ;;  %s253_s1 = inlined_call_operand.vmem [shape: f32[1,32], index: 1, kind: input, shape index: {}]   ;;  %s254_s2 = inlined_call_operand.vmem [shape: f32[1,32], index: 2, kind: input, shape index: {}]   ;;  %s255_s3 = inlined_call_operand.vmem [shape: bf16[32,64], index: 3, kind: input, shape index: {}]   ;;  %s256_s4 = inlined_call_operand.hbm [shape: f32[16,64], index: 4, kind: output, shape index: {}]  }
   0x1   :  { %v19_v0 = vld [vmem:[%s252_s0] sm:$0xff]  ;;  %v20_v1 = vld [vmem:[%s252_s0 + $0x8] sm:$0xff] }
   0x2   :  { %v22_v2 = vsel %vm21_vm0, %v19_v0, 0.0 }
   0x3   :  { %23 = vadd.xlane.f32.xlu0 %v22_v2 }
   0x4   :  { %9 = vsyncpa [#allocation3], 0  ;;  %v25_v3 = vsel %vm21_vm0, %v20_v1, 0.0  ;;  %v168_v14 = vld [vmem:[%s255_s3 + $0x8] sm:$0xff]   ;;  %v196_v15 = vmov 0.0   ;;  %vm197_vm1 = vmmov 0  }
   0x5   :  { %155 = vmatprep.subr.bf16.mxu0 %v196_v15  ;;  %159 = vmatprep.mubr.msk.bf16.mxu0 %vm197_vm1, %v196_v15  ;;  %v169_v16 = vld [vmem:[%s255_s3] sm:$0xff]   ;;  %vm128_vm2 = vcmask 523264   ;;  %s198_s25 = smov [#allocation2]  }
   0x6   :  { %156 = vmatpush3.bf16.msra.mxu0 %v168_v14  ;;  %v147_v25 = vld [vmem:[%s253_s1] ss:$0 sm:$0xff]  ;;  %s136_s26 = sshll.u32 %s198_s25, 4  ;;  %s137_s26 = int_to_ptr.vmem [resolvable:$true] %s136_s26 }
   0x7   :  { %26 = vadd.xlane.f32.xlu0 %v25_v3  ;;  %157 = vmatprep.subr.bf16.mxu0 %v196_v15  ;;  %v148_v29 = vld [vmem:[%s254_s2] ss:$0 sm:$0xff]  ;;  %s174_s1 = scalar_lea.vmem %s137_s26, 256  ;;  %p179_p1 = scmp.lt.s32.totalorder %s137_s26, %s137_s26 }
   0x8   :  { %p175_p0 = scmp.ne.s32.totalorder %s137_s26, %s174_s1  ;;  %p180_p2 = scmp.lt.s32.totalorder %s174_s1, %s174_s1 }
   0xa   :  { %158 = vmatpush3.bf16.msra.mxu0 %v169_v16  ;;  %p181_p3 = por %p180_p2, %p179_p1 }
   0xc   :  { %p182_p4 = pnand %p181_p3, %p175_p0 }
  0x8c   :  { %v24_v4 = vpop.xlane.xlu0 %23 }
  0x8d   :  { %v29_v5 = vmul.f32 0.03125, %v24_v4 }
  0x8f   :  { %v31_v6 = vsub.f32 %v19_v0, %v29_v5 }
  0x90   :  { %v27_v7 = vpop.xlane.xlu0 %26 }
  0x91   :  { %v30_v8 = vmul.f32 0.03125, %v27_v7  ;;  %v33_v9 = vmul.f32 %v31_v6, %v31_v6 }
  0x93   :  { %v32_v10 = vsub.f32 %v20_v1, %v30_v8  ;;  %v35_v11 = vsel %vm21_vm0, %v33_v9, 0.0 }
  0x94   :  { %36 = vadd.xlane.f32.xlu1 %v35_v11 }
  0x95   :  { %v34_v12 = vmul.f32 %v32_v10, %v32_v10 }
  0x97   :  { %v38_v13 = vsel %vm21_vm0, %v34_v12, 0.0 }
  0x98   :  { %39 = vadd.xlane.f32.xlu1 %v38_v13 }
 0x11d   :  { %v37_v17 = vpop.xlane.xlu1 %36 }
 0x11e   :  { %v41_v18 = vmul.f32 0.03125, %v37_v17 }
 0x120   :  { %v43_v19 = vadd.f32 1e-05, %v41_v18 }
 0x121   :  { %v40_v20 = vpop.xlane.xlu1 %39 }
 0x122   :  { %170 = vrsqrt.f32 %v43_v19  ;;  %v42_v21 = vmul.f32 0.03125, %v40_v20 }
 0x124   :  { %v44_v22 = vadd.f32 1e-05, %v42_v21 }
 0x126   :  { %172 = vrsqrt.f32 %v44_v22 }
 0x12f   :  { %v171_v23 = vpop.eup %170 }
 0x130   :  { %v47_v24 = vmul.f32 %v171_v23, %v31_v6 }
 0x132   :  { %v56_v28 = vmul.f32 %v147_v25, %v47_v24 }
 0x133   :  { %v173_v26 = vpop.eup %172 }
 0x134   :  { %v48_v27 = vmul.f32 %v173_v26, %v32_v10  ;;  %v65_v31 = vadd.f32 %v148_v29, %v56_v28 }
 0x136   :  { %v57_v30 = vmul.f32 %v147_v25, %v48_v27 }
 0x138   :  { %v66_v32 = vadd.f32 %v148_v29, %v57_v30 }
 0x13a   :  { %v67_v33 = vpack.c.bf16 %v66_v32, %v65_v31 }
 0x13c   :  { %160 = vmatmul.mubr.msk.bf16.vlgmr.msra.gmra.mxu0 %vm21_vm0, %v67_v33 }
 0x1fc   :  { %v121_v34 = vpop.f32.mrf.mxu0 }
 0x1fd   :  { %129 = vst.msk [vmem:[#allocation2] sm:$0xff] %vm128_vm2, %v121_v34 }
 0x1fe   :  { %v161_v35 = vpop.f32.mrf.mxu0 }
 0x200   :  { %v124_v36 = vpop.f32.mrf.mxu0 }
 0x201   :  { %130 = vst.msk [vmem:[#allocation2 + $0x8] sm:$0xff] %vm128_vm2, %v124_v36 }
 0x202   :  { %v162_v37 = vpop.f32.mrf.mxu0 }
 0x203   :  { %185 = shalt.err (!%p182_p4)
}
 0x204   :  { %s199_s2 = smov 128   ;;  %s200_s27 = smov 8  }
 0x205   :  { %142 = dma.vmem_to_hbm [thread:$0]  %s137_s26, 256, %s256_s4, [#allocation3], %s199_s2, %s199_s2, %s200_s27  }
 0x206   :  { %194 = dma.done.wait [#allocation3], 256  }
 0x207   :  { %195 = vsyncadd [#allocation3], 4294967040 }
 0x208   :  { %146 = vsyncpa [#allocation3], 1 }

// kernel: base_hf_gpt_forward.31
= control target key start
LH: loop header
LB: loop body
LE: loop exit
PB: predicated region body
PF: predicated region fallthrough
CT: control target
= control target key end

     0   :  { %vm25_vm0 = vcmask 261120   ;;  %v177_v14 = vmov 0.0   ;;  %vm178_vm1 = vmmov 0   ;;  %vm141_vm2 = vcmask 7168   ;;  %s241_s0 = inlined_call_operand.vmem [shape: f32[16,32], index: 0, kind: input, shape index: {}]   ;;  %s242_s3 = inlined_call_operand.vmem [shape: bf16[32,1], index: 3, kind: input, shape index: {}]   ;;  %s243_s4 = inlined_call_operand.<no memory space> [shape: f32[1,1], index: 4, kind: input, shape index: {}]   ;;  %s244_s1 = inlined_call_operand.vmem [shape: f32[1,32], index: 1, kind: input, shape index: {}]   ;;  %s245_s2 = inlined_call_operand.vmem [shape: f32[1,32], index: 2, kind: input, shape index: {}]   ;;  %s246_s5 = inlined_call_operand.vmem [shape: f32[16,1], index: 5, kind: output, shape index: {}]  }
   0x1   :  { %v23_v0 = vld [vmem:[%s241_s0] sm:$0xff]  ;;  %v24_v1 = vld [vmem:[%s241_s0 + $0x8] sm:$0xff]  ;;  %157 = vmatprep.subr.bf16.mxu0 %v177_v14  ;;  %161 = vmatprep.mubr.msk.bf16.mxu0 %vm178_vm1, %v177_v14  ;;  %v10_v17 = vstv %s243_s4 }
   0x2   :  { %v26_v2 = vsel %vm25_vm0, %v23_v0, 0.0  ;;  %v29_v3 = vsel %vm25_vm0, %v24_v1, 0.0  ;;  %v167_v15 = vld [vmem:[%s242_s3 + $0x8] sm:$0xff]   ;;  %v168_v16 = vld [vmem:[%s242_s3] sm:$0xff]   ;;  %11 = vst [vmem:[#allocation2] sm:$0x1] %v10_v17 }
   0x3   :  { %27 = vadd.xlane.f32.xlu0 %v26_v2  ;;  %158 = vmatpush3.bf16.msra.mxu0 %v167_v15  ;;  %v148_v26 = vld [vmem:[%s244_s1] ss:$0 sm:$0xff] }
   0x4   :  { %159 = vmatprep.subr.bf16.mxu0 %v177_v14  ;;  %v149_v30 = vld [vmem:[%s245_s2] ss:$0 sm:$0xff] }
   0x7   :  { %30 = vadd.xlane.f32.xlu0 %v29_v3  ;;  %160 = vmatpush3.bf16.msra.mxu0 %v168_v16 }
   0x9   :  { %v150_v35 = vld [vmem:[#allocation2] ss:$0 sm:$0xff] }
  0x8c   :  { %v28_v4 = vpop.xlane.xlu0 %27 }
  0x8d   :  { %v33_v5 = vmul.f32 0.03125, %v28_v4 }
  0x8f   :  { %v35_v6 = vsub.f32 %v23_v0, %v33_v5 }
  0x90   :  { %v31_v7 = vpop.xlane.xlu0 %30 }
  0x91   :  { %v34_v8 = vmul.f32 0.03125, %v31_v7  ;;  %v37_v9 = vmul.f32 %v35_v6, %v35_v6 }
  0x93   :  { %v36_v10 = vsub.f32 %v24_v1, %v34_v8  ;;  %v39_v11 = vsel %vm25_vm0, %v37_v9, 0.0 }
  0x94   :  { %40 = vadd.xlane.f32.xlu1 %v39_v11 }
  0x95   :  { %v38_v12 = vmul.f32 %v36_v10, %v36_v10 }
  0x97   :  { %v42_v13 = vsel %vm25_vm0, %v38_v12, 0.0 }
  0x98   :  { %43 = vadd.xlane.f32.xlu1 %v42_v13 }
 0x11d   :  { %v41_v18 = vpop.xlane.xlu1 %40 }
 0x11e   :  { %v45_v19 = vmul.f32 0.03125, %v41_v18 }
 0x120   :  { %v47_v20 = vadd.f32 1e-05, %v45_v19 }
 0x121   :  { %v44_v21 = vpop.xlane.xlu1 %43 }
 0x122   :  { %169 = vrsqrt.f32 %v47_v20  ;;  %v46_v22 = vmul.f32 0.03125, %v44_v21 }
 0x124   :  { %v48_v23 = vadd.f32 1e-05, %v46_v22 }
 0x126   :  { %171 = vrsqrt.f32 %v48_v23 }
 0x12f   :  { %v170_v24 = vpop.eup %169 }
 0x130   :  { %v51_v25 = vmul.f32 %v170_v24, %v35_v6 }
 0x132   :  { %v60_v29 = vmul.f32 %v148_v26, %v51_v25 }
 0x133   :  { %v172_v27 = vpop.eup %171 }
 0x134   :  { %v52_v28 = vmul.f32 %v172_v27, %v36_v10  ;;  %v69_v32 = vadd.f32 %v149_v30, %v60_v29 }
 0x136   :  { %v61_v31 = vmul.f32 %v148_v26, %v52_v28 }
 0x138   :  { %v70_v33 = vadd.f32 %v149_v30, %v61_v31 }
 0x13a   :  { %v71_v34 = vpack.c.bf16 %v70_v33, %v69_v32 }
 0x13c   :  { %162 = vmatmul.mubr.msk.bf16.vlgmr.msra.gmra.mxu0 %vm25_vm0, %v71_v34 }
 0x1fc   :  { %v132_v36 = vpop.f32.mrf.mxu0 }
 0x1fd   :  { %v133_v37 = vadd.f32 %v150_v35, %v132_v36 }
 0x1fe   :  { %v163_v38 = vpop.f32.mrf.mxu0 }
 0x1ff   :  { %173 = vtanh.f32 %v133_v37 }
 0x200   :  { %v135_v39 = vpop.f32.mrf.mxu0 }
 0x201   :  { %v136_v40 = vadd.f32 %v150_v35, %v135_v39 }
 0x202   :  { %v164_v41 = vpop.f32.mrf.mxu0 }
 0x203   :  { %175 = vtanh.f32 %v136_v40 }
 0x20c   :  { %v174_v42 = vpop.eup %173 }
 0x20d   :  { %142 = vst.msk [vmem:[%s246_s5] sm:$0xff] %vm141_vm2, %v174_v42 }
 0x210   :  { %v176_v43 = vpop.eup %175 }
 0x211   :  { %143 = vst.msk [vmem:[%s246_s5 + $0x8] sm:$0xff] %vm141_vm2, %v176_v43 }

</bundles_post_ra>
